<compile_context>
chip_gen: v7x
topology: tpu7x:2x2x1
jax: 0.10.0
libtpu: 0.0.40
codegen_flags: <defaults>
</compile_context>

<pallas_src>
import jax
import jax.numpy as jnp
import numpy as np
from jax import lax
from jax.experimental import pallas as pl
from jax.experimental.pallas import tpu as pltpu


def _make_kernel(C, MID, H, W, dil, NB):
    HW = H * W
    NBHW = NB * HW
    K_SLAB = 9 * MID + 1                 # 9 taps x MID channels + ones row (bias)
    OFFSETS = [(dy, dx) for dy in (-dil, 0, dil) for dx in (-dil, 0, dil)]

    def kernel(x_ref, masks_ref, w0_ref, b0_ref, w1_ref, w2_ref,
               wf_ref, bf_ref, o_ref, slab_ref):
        # ---- 1x1 reduce conv (+ folded BN) + ReLU -> (MID, NBHW) ----
        y = jnp.dot(w0_ref[...], x_ref[...],
                    preferred_element_type=jnp.float32,
                    precision=lax.Precision.HIGHEST)
        y = jnp.maximum(y + b0_ref[...], 0.0)

        # Ones row partnering the bias column folded into w1/w2.  Written every
        # step (cheap single vst); a program_id==0 guard would be wrong under
        # megacore grid sharding.
        slab_ref[9 * MID:K_SLAB, :] = jnp.ones((1, NBHW), jnp.float32)

        def dilated_conv_bn_relu(y_in, w_ref):
            # 3x3 conv (dilation=dil, padding=dil, same spatial size) + folded
            # BN + ReLU as one (MID, 9*MID+1) @ (9*MID+1, NBHW) matmul.  Taps
            # are stored straight into the VMEM slab (no sublane concatenate);
            # the prefetched masks zero every tap that would read outside its
            # own image, so the lane-axis roll never leaks across image or
            # spatial boundaries (this is what makes batch folding safe).
            mrow = 0
            for t, (dy, dx) in enumerate(OFFSETS):
                s = dy * W + dx
                tap = jnp.roll(y_in, -s, axis=1) if s != 0 else y_in
                if not (dy == 0 and dx == 0):
                    tap = tap * masks_ref[mrow * MID:(mrow + 1) * MID, :]
                    mrow += 1
                slab_ref[t * MID:(t + 1) * MID, :] = tap
            acc = jnp.dot(w_ref[...], slab_ref[...],
                          preferred_element_type=jnp.float32,
                          precision=lax.Precision.HIGHEST)
            return jnp.maximum(acc, 0.0)

        y = dilated_conv_bn_relu(y, w1_ref)
        y = dilated_conv_bn_relu(y, w2_ref)

        # ---- final 1x1 conv (MID -> 1) on the VPU ----
        # M=1, K=MID wastes an MXU push + result-FIFO pop; scalar FMAs on the
        # already-resident (MID, NBHW) tile are strictly cheaper.
        att = wf_ref[0] * y[0:1, :]
        for m in range(1, MID):
            att = att + wf_ref[m] * y[m:m + 1, :]
        att = att + bf_ref[0]
        o_ref[...] = att.astype(o_ref.dtype)              # (1, NBHW) only

    return kernel


def _make_masks(H, W, dil, MID, NB):
    """Zero-padding validity masks for the 8 non-center taps.

    Shape (8*MID, NB*HW): per-tap mask broadcast to MID sublanes and tiled
    over the NB lane-folded images (masks are per-image local, so tiling is
    exact)."""
    hh, ww = np.meshgrid(np.arange(H), np.arange(W), indexing="ij")
    rows = []
    for dy in (-dil, 0, dil):
        for dx in (-dil, 0, dil):
            if dy == 0 and dx == 0:
                continue
            valid = ((hh + dy >= 0) & (hh + dy < H) &
                     (ww + dx >= 0) & (ww + dx < W))
            rows.append(valid.reshape(-1))
    m = np.stack(rows, axis=0).astype(np.float32)            # (8, HW)
    m = np.repeat(m[:, None, :], MID, axis=1).reshape(8 * MID, H * W)
    m = np.tile(m, (1, NB))                                   # (8*MID, NB*HW)
    return jnp.asarray(m)


def spatial_gate_pallas(x, kp, dil, *, batch_per_step=None):
    N, C, H, W = x.shape
    HW = H * W
    MID = kp["w0"].shape[0]

    if batch_per_step is None:
        # Fold batch onto the lane axis, but keep >= 2 grid steps so both v7x
        # TensorCores get work (single-TC v5e/v6e may pass batch_per_step=N).
        batch_per_step = N // 2 if (N % 2 == 0 and N >= 4) else 1
    NB = batch_per_step
    assert N % NB == 0, "batch_per_step must divide N"
    G = N // NB
    NBHW = NB * HW

    # NC(NB*HW) layout: channels on sublanes, NB images side by side on lanes.
    x2 = x.reshape(G, NB, C, HW).transpose(0, 2, 1, 3).reshape(G, C, NBHW)
    masks = _make_masks(H, W, dil, MID, NB)

    kernel = _make_kernel(C, MID, H, W, dil, NB)

    def full_vmem(shape):
        return pl.BlockSpec(shape, lambda g, _s=shape: (0,) * len(_s))

    smem_spec = pl.BlockSpec(memory_space=pltpu.MemorySpace.SMEM)

    att = pl.pallas_call(
        kernel,
        out_shape=jax.ShapeDtypeStruct((G, 1, NBHW), x.dtype),
        grid_spec=pltpu.PrefetchScalarGridSpec(
            num_scalar_prefetch=0,
            grid=(G,),
            in_specs=[
                pl.BlockSpec((pl.Squeezed(), C, NBHW), lambda g: (g, 0, 0)),
                full_vmem(masks.shape),          # boundary masks (fetched once)
                full_vmem(kp["w0"].shape),
                full_vmem(kp["b0"].shape),
                full_vmem(kp["w1"].shape),       # bias column folded in
                full_vmem(kp["w2"].shape),       # bias column folded in
                smem_spec,                       # wf: MID scalars for VPU epilogue
                smem_spec,                       # bf: 1 scalar
            ],
            out_specs=pl.BlockSpec((pl.Squeezed(), 1, NBHW),
                                   lambda g: (g, 0, 0)),
            scratch_shapes=[pltpu.VMEM((9 * MID + 1, NBHW), jnp.float32)],
        ),
        compiler_params=pltpu.CompilerParams(
            dimension_semantics=("parallel",)),
    )(x2, masks, kp["w0"], kp["b0"], kp["w1"], kp["w2"], kp["wf"], kp["bf"])

    # Undo the lane folding -> (N, 1, H, W).
    att = att.reshape(G, 1, NB, HW).transpose(0, 2, 1, 3).reshape(N, 1, H, W)
    # expand_as: lazy channel broadcast in the wrapper (fuses into consumers
    # under jit) instead of writing C copies from the kernel.
    return jnp.broadcast_to(att, (N, C, H, W))


def init_params(key, gate_channel, reduction_ratio=16):
    """Deterministic synthetic weights; BN (eval mode) folded into convs."""
    mid = gate_channel // reduction_ratio
    eps = 1e-5
    ks = jax.random.split(key, 16)

    def bn_fold(w, b, gamma, beta, mean, var):
        scale = gamma / jnp.sqrt(var + eps)
        return w * scale[:, None, None, None], (b - mean) * scale + beta

    def conv_w(k, shape):
        return 0.1 * jax.random.normal(k, shape, jnp.float32)

    # gate_s_conv_reduce0 (1x1) + gate_s_bn_reduce0
    w0 = conv_w(ks[0], (mid, gate_channel, 1, 1))
    b0 = 0.1 * jax.random.normal(ks[1], (mid,), jnp.float32)
    g0 = 1.0 + 0.1 * jax.random.normal(ks[2], (mid,), jnp.float32)
    be0 = 0.1 * jax.random.normal(ks[3], (mid,), jnp.float32)
    w0f, b0f = bn_fold(w0, b0, g0, be0, jnp.zeros(mid), jnp.ones(mid))

    # gate_s_conv_di_0 (3x3, dilated) + gate_s_bn_di_0
    w1 = conv_w(ks[4], (mid, mid, 3, 3))
    b1 = 0.1 * jax.random.normal(ks[5], (mid,), jnp.float32)
    g1 = 1.0 + 0.1 * jax.random.normal(ks[6], (mid,), jnp.float32)
    be1 = 0.1 * jax.random.normal(ks[7], (mid,), jnp.float32)
    w1f, b1f = bn_fold(w1, b1, g1, be1, jnp.zeros(mid), jnp.ones(mid))

    # gate_s_conv_di_1 (3x3, dilated) + gate_s_bn_di_1
    w2 = conv_w(ks[8], (mid, mid, 3, 3))
    b2 = 0.1 * jax.random.normal(ks[9], (mid,), jnp.float32)
    g2 = 1.0 + 0.1 * jax.random.normal(ks[10], (mid,), jnp.float32)
    be2 = 0.1 * jax.random.normal(ks[11], (mid,), jnp.float32)
    w2f, b2f = bn_fold(w2, b2, g2, be2, jnp.zeros(mid), jnp.ones(mid))

    # gate_s_conv_final (1x1, mid -> 1), no BN after it
    wf = conv_w(ks[12], (1, mid, 1, 1))
    bf = 0.1 * jax.random.normal(ks[13], (1,), jnp.float32)

    folded = dict(w0=w0f, b0=b0f, w1=w1f, b1=b1f, w2=w2f, b2=b2f, wf=wf, bf=bf)

    # Kernel-format parameters:
    #  * dilated-conv weights repacked so each conv is a single matmul:
    #    stacked column index = (kh*3 + kw) * mid + in_channel, with the
    #    folded-BN bias appended as an extra column (partnering the slab's
    #    ones row) -> shape (mid, 9*mid + 1).
    #  * wf/bf flattened to scalars for the SMEM/VPU epilogue.
    def pack_dilated(wf_, bf_):
        w_flat = jnp.transpose(wf_, (0, 2, 3, 1)).reshape(mid, 9 * mid)
        return jnp.concatenate([w_flat, bf_.reshape(mid, 1)], axis=1)

    kern = dict(
        w0=w0f.reshape(mid, gate_channel),
        b0=b0f.reshape(mid, 1),
        w1=pack_dilated(w1f, b1f),
        w2=pack_dilated(w2f, b2f),
        wf=wf.reshape(mid),
        bf=bf.reshape(1),
    )
    return folded, kern


def spatial_gate_ref(x, p, dil):
    """Pure-JAX reference (NCHW), using the same folded parameters."""
    def conv(v, w, b, dilation, padding):
        y = jax.lax.conv_general_dilated(
            v, w, (1, 1), [(padding, padding), (padding, padding)],
            rhs_dilation=(dilation, dilation),
            dimension_numbers=("NCHW", "OIHW", "NCHW"),
            precision=jax.lax.Precision.HIGHEST)
        return y + b[None, :, None, None]

    y = jax.nn.relu(conv(x, p["w0"], p["b0"], 1, 0))
    y = jax.nn.relu(conv(y, p["w1"], p["b1"], dil, dil))
    y = jax.nn.relu(conv(y, p["w2"], p["b2"], dil, dil))
    y = conv(y, p["wf"], p["bf"], 1, 0)
    return jnp.broadcast_to(y, x.shape)


if __name__ == "__main__":
    key = jax.random.PRNGKey(0)
    kx, kp_key = jax.random.split(key)

    N, C, H, W = 4, 32, 16, 16
    reduction_ratio, dilation_val = 16, 4

    x = jax.random.normal(kx, (N, C, H, W), dtype=jnp.float32)
    folded, kern_params = init_params(kp_key, C, reduction_ratio)

    ref = spatial_gate_ref(x, folded, dilation_val)

    # Default: 2 images folded per grid step -> grid=(2,) (both v7x TCs busy,
    # 512-lane matmuls).
    out = spatial_gate_pallas(x, kern_params, dilation_val)
    out = jax.block_until_ready(out)
    np.testing.assert_allclose(np.asarray(out), np.asarray(ref),
                               rtol=1e-4, atol=1e-4)

    # Also exercise the unfolded path (1 image per step, grid=(4,)).
    out1 = spatial_gate_pallas(x, kern_params, dilation_val, batch_per_step=1)
    out1 = jax.block_until_ready(out1)
    np.testing.assert_allclose(np.asarray(out1), np.asarray(ref),
                               rtol=1e-4, atol=1e-4)

    print("KERNEL_OK")
</pallas_src>

<mosaic_0001>
module attributes {stable_mosaic.version = 11 : i64} {
  func.func @kernel(%arg0: i32, %arg1: memref<1x32x512xf32, #tpu.memory_space<vmem>>, %arg2: memref<16x512xf32, #tpu.memory_space<vmem>>, %arg3: memref<2x32xf32, #tpu.memory_space<vmem>>, %arg4: memref<2x1xf32, #tpu.memory_space<vmem>>, %arg5: memref<2x19xf32, #tpu.memory_space<vmem>>, %arg6: memref<2x19xf32, #tpu.memory_space<vmem>>, %arg7: memref<2xf32, #tpu.memory_space<smem>>, %arg8: memref<1xf32, #tpu.memory_space<smem>>, %arg9: memref<1x1x512xf32, #tpu.memory_space<vmem>>, %arg10: memref<19x512xf32, #tpu.memory_space<vmem>>) attributes {dimension_semantics = [#tpu.dimension_semantics<parallel>], iteration_bounds = array<i64: 2>, scalar_prefetch = 0 : i64, scratch_operands = 1 : i64, tpu.core_type = #tpu.core_type<tc>, window_params = [{transform_indices = @transform_0, window_bounds = array<i64: 1, 32, 512>}, {pipeline_mode = #tpu.pipeline_mode<synchronous>, transform_indices = @transform_1, window_bounds = array<i64: 16, 512>}, {pipeline_mode = #tpu.pipeline_mode<synchronous>, transform_indices = @transform_2, window_bounds = array<i64: 2, 32>}, {pipeline_mode = #tpu.pipeline_mode<synchronous>, transform_indices = @transform_3, window_bounds = array<i64: 2, 1>}, {pipeline_mode = #tpu.pipeline_mode<synchronous>, transform_indices = @transform_4, window_bounds = array<i64: 2, 19>}, {pipeline_mode = #tpu.pipeline_mode<synchronous>, transform_indices = @transform_5, window_bounds = array<i64: 2, 19>}, {transform_indices = @transform_6, window_bounds = array<i64: 2>}, {transform_indices = @transform_7, window_bounds = array<i64: 1>}, {transform_indices = @transform_8, window_bounds = array<i64: 1, 1, 512>}]} {
    %c0 = arith.constant 0 : index
    %c0_0 = arith.constant 0 : index
    %0 = vector.load %arg3[%c0, %c0_0] : memref<2x32xf32, #tpu.memory_space<vmem>>, vector<2x32xf32>
    %c0_1 = arith.constant 0 : index
    %c0_2 = arith.constant 0 : index
    %c0_3 = arith.constant 0 : index
    %1 = vector.load %arg1[%c0_1, %c0_2, %c0_3] : memref<1x32x512xf32, #tpu.memory_space<vmem>>, vector<1x32x512xf32>
    %2 = vector.shape_cast %1 : vector<1x32x512xf32> to vector<32x512xf32>
    %cst = arith.constant dense<0.000000e+00> : vector<2x512xf32>
    %3 = tpu.matmul %0, %2, %cst {dimension_numbers = #tpu.dot_dimension_numbers<[1], [0], [0], [1], [0, 0, 1, 1], [], []>, precision = #tpu.contract_precision<fp32>} : vector<2x32xf32>, vector<32x512xf32>, vector<2x512xf32> -> vector<2x512xf32>
    %c0_4 = arith.constant 0 : index
    %c0_5 = arith.constant 0 : index
    %4 = vector.load %arg4[%c0_4, %c0_5] : memref<2x1xf32, #tpu.memory_space<vmem>>, vector<2x1xf32>
    %5 = vector.broadcast %4 : vector<2x1xf32> to vector<2x512xf32>
    %6 = arith.addf %3, %5 : vector<2x512xf32>
    %cst_6 = arith.constant 0.000000e+00 : f32
    %7 = vector.broadcast %cst_6 : f32 to vector<2x512xf32>
    %8 = arith.maximumf %6, %7 : vector<2x512xf32>
    %cst_7 = arith.constant 1.000000e+00 : f32
    %9 = vector.broadcast %cst_7 : f32 to vector<1x512xf32>
    %c18 = arith.constant 18 : index
    %c0_8 = arith.constant 0 : index
    %10 = vector.load %arg10[%c18, %c0_8] : memref<19x512xf32, #tpu.memory_space<vmem>>, vector<1x512xf32>
    tpu.vector_store %arg10[%c18, %c0_8], %9 {strides = array<i32>} : memref<19x512xf32, #tpu.memory_space<vmem>>, vector<1x512xf32>,
    %11 = vector.extract_strided_slice %8 {offsets = [0, 444], sizes = [2, 68], strides = [1, 1]} : vector<2x512xf32> to vector<2x68xf32>
    %12 = vector.extract_strided_slice %8 {offsets = [0, 0], sizes = [2, 444], strides = [1, 1]} : vector<2x512xf32> to vector<2x444xf32>
    %13 = tpu.concatenate %11, %12 in 1 : vector<2x68xf32>, vector<2x444xf32> -> vector<2x512xf32>
    %c0_9 = arith.constant 0 : index
    %c0_10 = arith.constant 0 : index
    %14 = vector.load %arg2[%c0_9, %c0_10] : memref<16x512xf32, #tpu.memory_space<vmem>>, vector<2x512xf32>
    %15 = arith.mulf %13, %14 : vector<2x512xf32>
    %c0_11 = arith.constant 0 : index
    %c0_12 = arith.constant 0 : index
    %16 = vector.load %arg10[%c0_11, %c0_12] : memref<19x512xf32, #tpu.memory_space<vmem>>, vector<2x512xf32>
    tpu.vector_store %arg10[%c0_11, %c0_12], %15 {strides = array<i32>} : memref<19x512xf32, #tpu.memory_space<vmem>>, vector<2x512xf32>,
    %17 = vector.extract_strided_slice %8 {offsets = [0, 448], sizes = [2, 64], strides = [1, 1]} : vector<2x512xf32> to vector<2x64xf32>
    %18 = vector.extract_strided_slice %8 {offsets = [0, 0], sizes = [2, 448], strides = [1, 1]} : vector<2x512xf32> to vector<2x448xf32>
    %19 = tpu.concatenate %17, %18 in 1 : vector<2x64xf32>, vector<2x448xf32> -> vector<2x512xf32>
    %c2 = arith.constant 2 : index
    %c0_13 = arith.constant 0 : index
    %20 = vector.load %arg2[%c2, %c0_13] : memref<16x512xf32, #tpu.memory_space<vmem>>, vector<2x512xf32>
    %21 = arith.mulf %19, %20 : vector<2x512xf32>
    %c2_14 = arith.constant 2 : index
    %c0_15 = arith.constant 0 : index
    %22 = vector.load %arg10[%c2_14, %c0_15] : memref<19x512xf32, #tpu.memory_space<vmem>>, vector<2x512xf32>
    tpu.vector_store %arg10[%c2_14, %c0_15], %21 {strides = array<i32>} : memref<19x512xf32, #tpu.memory_space<vmem>>, vector<2x512xf32>,
    %23 = vector.extract_strided_slice %8 {offsets = [0, 452], sizes = [2, 60], strides = [1, 1]} : vector<2x512xf32> to vector<2x60xf32>
    %24 = vector.extract_strided_slice %8 {offsets = [0, 0], sizes = [2, 452], strides = [1, 1]} : vector<2x512xf32> to vector<2x452xf32>
    %25 = tpu.concatenate %23, %24 in 1 : vector<2x60xf32>, vector<2x452xf32> -> vector<2x512xf32>
    %c4 = arith.constant 4 : index
    %c0_16 = arith.constant 0 : index
    %26 = vector.load %arg2[%c4, %c0_16] : memref<16x512xf32, #tpu.memory_space<vmem>>, vector<2x512xf32>
    %27 = arith.mulf %25, %26 : vector<2x512xf32>
    %c4_17 = arith.constant 4 : index
    %c0_18 = arith.constant 0 : index
    %28 = vector.load %arg10[%c4_17, %c0_18] : memref<19x512xf32, #tpu.memory_space<vmem>>, vector<2x512xf32>
    tpu.vector_store %arg10[%c4_17, %c0_18], %27 {strides = array<i32>} : memref<19x512xf32, #tpu.memory_space<vmem>>, vector<2x512xf32>,
    %29 = vector.extract_strided_slice %8 {offsets = [0, 508], sizes = [2, 4], strides = [1, 1]} : vector<2x512xf32> to vector<2x4xf32>
    %30 = vector.extract_strided_slice %8 {offsets = [0, 0], sizes = [2, 508], strides = [1, 1]} : vector<2x512xf32> to vector<2x508xf32>
    %31 = tpu.concatenate %29, %30 in 1 : vector<2x4xf32>, vector<2x508xf32> -> vector<2x512xf32>
    %c6 = arith.constant 6 : index
    %c0_19 = arith.constant 0 : index
    %32 = vector.load %arg2[%c6, %c0_19] : memref<16x512xf32, #tpu.memory_space<vmem>>, vector<2x512xf32>
    %33 = arith.mulf %31, %32 : vector<2x512xf32>
    %c6_20 = arith.constant 6 : index
    %c0_21 = arith.constant 0 : index
    %34 = vector.load %arg10[%c6_20, %c0_21] : memref<19x512xf32, #tpu.memory_space<vmem>>, vector<2x512xf32>
    tpu.vector_store %arg10[%c6_20, %c0_21], %33 {strides = array<i32>} : memref<19x512xf32, #tpu.memory_space<vmem>>, vector<2x512xf32>,
    %c8 = arith.constant 8 : index
    %c0_22 = arith.constant 0 : index
    %35 = vector.load %arg10[%c8, %c0_22] : memref<19x512xf32, #tpu.memory_space<vmem>>, vector<2x512xf32>
    tpu.vector_store %arg10[%c8, %c0_22], %8 {strides = array<i32>} : memref<19x512xf32, #tpu.memory_space<vmem>>, vector<2x512xf32>,
    %36 = vector.extract_strided_slice %8 {offsets = [0, 4], sizes = [2, 508], strides = [1, 1]} : vector<2x512xf32> to vector<2x508xf32>
    %37 = vector.extract_strided_slice %8 {offsets = [0, 0], sizes = [2, 4], strides = [1, 1]} : vector<2x512xf32> to vector<2x4xf32>
    %38 = tpu.concatenate %36, %37 in 1 : vector<2x508xf32>, vector<2x4xf32> -> vector<2x512xf32>
    %c8_23 = arith.constant 8 : index
    %c0_24 = arith.constant 0 : index
    %39 = vector.load %arg2[%c8_23, %c0_24] : memref<16x512xf32, #tpu.memory_space<vmem>>, vector<2x512xf32>
    %40 = arith.mulf %38, %39 : vector<2x512xf32>
    %c10 = arith.constant 10 : index
    %c0_25 = arith.constant 0 : index
    %41 = vector.load %arg10[%c10, %c0_25] : memref<19x512xf32, #tpu.memory_space<vmem>>, vector<2x512xf32>
    tpu.vector_store %arg10[%c10, %c0_25], %40 {strides = array<i32>} : memref<19x512xf32, #tpu.memory_space<vmem>>, vector<2x512xf32>,
    %42 = vector.extract_strided_slice %8 {offsets = [0, 60], sizes = [2, 452], strides = [1, 1]} : vector<2x512xf32> to vector<2x452xf32>
    %43 = vector.extract_strided_slice %8 {offsets = [0, 0], sizes = [2, 60], strides = [1, 1]} : vector<2x512xf32> to vector<2x60xf32>
    %44 = tpu.concatenate %42, %43 in 1 : vector<2x452xf32>, vector<2x60xf32> -> vector<2x512xf32>
    %c10_26 = arith.constant 10 : index
    %c0_27 = arith.constant 0 : index
    %45 = vector.load %arg2[%c10_26, %c0_27] : memref<16x512xf32, #tpu.memory_space<vmem>>, vector<2x512xf32>
    %46 = arith.mulf %44, %45 : vector<2x512xf32>
    %c12 = arith.constant 12 : index
    %c0_28 = arith.constant 0 : index
    %47 = vector.load %arg10[%c12, %c0_28] : memref<19x512xf32, #tpu.memory_space<vmem>>, vector<2x512xf32>
    tpu.vector_store %arg10[%c12, %c0_28], %46 {strides = array<i32>} : memref<19x512xf32, #tpu.memory_space<vmem>>, vector<2x512xf32>,
    %48 = vector.extract_strided_slice %8 {offsets = [0, 64], sizes = [2, 448], strides = [1, 1]} : vector<2x512xf32> to vector<2x448xf32>
    %49 = vector.extract_strided_slice %8 {offsets = [0, 0], sizes = [2, 64], strides = [1, 1]} : vector<2x512xf32> to vector<2x64xf32>
    %50 = tpu.concatenate %48, %49 in 1 : vector<2x448xf32>, vector<2x64xf32> -> vector<2x512xf32>
    %c12_29 = arith.constant 12 : index
    %c0_30 = arith.constant 0 : index
    %51 = vector.load %arg2[%c12_29, %c0_30] : memref<16x512xf32, #tpu.memory_space<vmem>>, vector<2x512xf32>
    %52 = arith.mulf %50, %51 : vector<2x512xf32>
    %c14 = arith.constant 14 : index
    %c0_31 = arith.constant 0 : index
    %53 = vector.load %arg10[%c14, %c0_31] : memref<19x512xf32, #tpu.memory_space<vmem>>, vector<2x512xf32>
    tpu.vector_store %arg10[%c14, %c0_31], %52 {strides = array<i32>} : memref<19x512xf32, #tpu.memory_space<vmem>>, vector<2x512xf32>,
    %54 = vector.extract_strided_slice %8 {offsets = [0, 68], sizes = [2, 444], strides = [1, 1]} : vector<2x512xf32> to vector<2x444xf32>
    %55 = vector.extract_strided_slice %8 {offsets = [0, 0], sizes = [2, 68], strides = [1, 1]} : vector<2x512xf32> to vector<2x68xf32>
    %56 = tpu.concatenate %54, %55 in 1 : vector<2x444xf32>, vector<2x68xf32> -> vector<2x512xf32>
    %c14_32 = arith.constant 14 : index
    %c0_33 = arith.constant 0 : index
    %57 = vector.load %arg2[%c14_32, %c0_33] : memref<16x512xf32, #tpu.memory_space<vmem>>, vector<2x512xf32>
    %58 = arith.mulf %56, %57 : vector<2x512xf32>
    %c16 = arith.constant 16 : index
    %c0_34 = arith.constant 0 : index
    %59 = vector.load %arg10[%c16, %c0_34] : memref<19x512xf32, #tpu.memory_space<vmem>>, vector<2x512xf32>
    tpu.vector_store %arg10[%c16, %c0_34], %58 {strides = array<i32>} : memref<19x512xf32, #tpu.memory_space<vmem>>, vector<2x512xf32>,
    %c0_35 = arith.constant 0 : index
    %c0_36 = arith.constant 0 : index
    %60 = vector.load %arg5[%c0_35, %c0_36] : memref<2x19xf32, #tpu.memory_space<vmem>>, vector<2x19xf32>
    %c0_37 = arith.constant 0 : index
    %c0_38 = arith.constant 0 : index
    %61 = vector.load %arg10[%c0_37, %c0_38] : memref<19x512xf32, #tpu.memory_space<vmem>>, vector<19x512xf32>
    %cst_39 = arith.constant dense<0.000000e+00> : vector<2x512xf32>
    %62 = tpu.matmul %60, %61, %cst_39 {dimension_numbers = #tpu.dot_dimension_numbers<[1], [0], [0], [1], [0, 0, 1, 1], [], []>, precision = #tpu.contract_precision<fp32>} : vector<2x19xf32>, vector<19x512xf32>, vector<2x512xf32> -> vector<2x512xf32>
    %cst_40 = arith.constant 0.000000e+00 : f32
    %63 = vector.broadcast %cst_40 : f32 to vector<2x512xf32>
    %64 = arith.maximumf %62, %63 : vector<2x512xf32>
    %65 = vector.extract_strided_slice %64 {offsets = [0, 444], sizes = [2, 68], strides = [1, 1]} : vector<2x512xf32> to vector<2x68xf32>
    %66 = vector.extract_strided_slice %64 {offsets = [0, 0], sizes = [2, 444], strides = [1, 1]} : vector<2x512xf32> to vector<2x444xf32>
    %67 = tpu.concatenate %65, %66 in 1 : vector<2x68xf32>, vector<2x444xf32> -> vector<2x512xf32>
    %c0_41 = arith.constant 0 : index
    %c0_42 = arith.constant 0 : index
    %68 = vector.load %arg2[%c0_41, %c0_42] : memref<16x512xf32, #tpu.memory_space<vmem>>, vector<2x512xf32>
    %69 = arith.mulf %67, %68 : vector<2x512xf32>
    %c0_43 = arith.constant 0 : index
    %c0_44 = arith.constant 0 : index
    %70 = vector.load %arg10[%c0_43, %c0_44] : memref<19x512xf32, #tpu.memory_space<vmem>>, vector<2x512xf32>
    tpu.vector_store %arg10[%c0_43, %c0_44], %69 {strides = array<i32>} : memref<19x512xf32, #tpu.memory_space<vmem>>, vector<2x512xf32>,
    %71 = vector.extract_strided_slice %64 {offsets = [0, 448], sizes = [2, 64], strides = [1, 1]} : vector<2x512xf32> to vector<2x64xf32>
    %72 = vector.extract_strided_slice %64 {offsets = [0, 0], sizes = [2, 448], strides = [1, 1]} : vector<2x512xf32> to vector<2x448xf32>
    %73 = tpu.concatenate %71, %72 in 1 : vector<2x64xf32>, vector<2x448xf32> -> vector<2x512xf32>
    %c2_45 = arith.constant 2 : index
    %c0_46 = arith.constant 0 : index
    %74 = vector.load %arg2[%c2_45, %c0_46] : memref<16x512xf32, #tpu.memory_space<vmem>>, vector<2x512xf32>
    %75 = arith.mulf %73, %74 : vector<2x512xf32>
    %c2_47 = arith.constant 2 : index
    %c0_48 = arith.constant 0 : index
    %76 = vector.load %arg10[%c2_47, %c0_48] : memref<19x512xf32, #tpu.memory_space<vmem>>, vector<2x512xf32>
    tpu.vector_store %arg10[%c2_47, %c0_48], %75 {strides = array<i32>} : memref<19x512xf32, #tpu.memory_space<vmem>>, vector<2x512xf32>,
    %77 = vector.extract_strided_slice %64 {offsets = [0, 452], sizes = [2, 60], strides = [1, 1]} : vector<2x512xf32> to vector<2x60xf32>
    %78 = vector.extract_strided_slice %64 {offsets = [0, 0], sizes = [2, 452], strides = [1, 1]} : vector<2x512xf32> to vector<2x452xf32>
    %79 = tpu.concatenate %77, %78 in 1 : vector<2x60xf32>, vector<2x452xf32> -> vector<2x512xf32>
    %c4_49 = arith.constant 4 : index
    %c0_50 = arith.constant 0 : index
    %80 = vector.load %arg2[%c4_49, %c0_50] : memref<16x512xf32, #tpu.memory_space<vmem>>, vector<2x512xf32>
    %81 = arith.mulf %79, %80 : vector<2x512xf32>
    %c4_51 = arith.constant 4 : index
    %c0_52 = arith.constant 0 : index
    %82 = vector.load %arg10[%c4_51, %c0_52] : memref<19x512xf32, #tpu.memory_space<vmem>>, vector<2x512xf32>
    tpu.vector_store %arg10[%c4_51, %c0_52], %81 {strides = array<i32>} : memref<19x512xf32, #tpu.memory_space<vmem>>, vector<2x512xf32>,
    %83 = vector.extract_strided_slice %64 {offsets = [0, 508], sizes = [2, 4], strides = [1, 1]} : vector<2x512xf32> to vector<2x4xf32>
    %84 = vector.extract_strided_slice %64 {offsets = [0, 0], sizes = [2, 508], strides = [1, 1]} : vector<2x512xf32> to vector<2x508xf32>
    %85 = tpu.concatenate %83, %84 in 1 : vector<2x4xf32>, vector<2x508xf32> -> vector<2x512xf32>
    %c6_53 = arith.constant 6 : index
    %c0_54 = arith.constant 0 : index
    %86 = vector.load %arg2[%c6_53, %c0_54] : memref<16x512xf32, #tpu.memory_space<vmem>>, vector<2x512xf32>
    %87 = arith.mulf %85, %86 : vector<2x512xf32>
    %c6_55 = arith.constant 6 : index
    %c0_56 = arith.constant 0 : index
    %88 = vector.load %arg10[%c6_55, %c0_56] : memref<19x512xf32, #tpu.memory_space<vmem>>, vector<2x512xf32>
    tpu.vector_store %arg10[%c6_55, %c0_56], %87 {strides = array<i32>} : memref<19x512xf32, #tpu.memory_space<vmem>>, vector<2x512xf32>,
    %c8_57 = arith.constant 8 : index
    %c0_58 = arith.constant 0 : index
    %89 = vector.load %arg10[%c8_57, %c0_58] : memref<19x512xf32, #tpu.memory_space<vmem>>, vector<2x512xf32>
    tpu.vector_store %arg10[%c8_57, %c0_58], %64 {strides = array<i32>} : memref<19x512xf32, #tpu.memory_space<vmem>>, vector<2x512xf32>,
    %90 = vector.extract_strided_slice %64 {offsets = [0, 4], sizes = [2, 508], strides = [1, 1]} : vector<2x512xf32> to vector<2x508xf32>
    %91 = vector.extract_strided_slice %64 {offsets = [0, 0], sizes = [2, 4], strides = [1, 1]} : vector<2x512xf32> to vector<2x4xf32>
    %92 = tpu.concatenate %90, %91 in 1 : vector<2x508xf32>, vector<2x4xf32> -> vector<2x512xf32>
    %c8_59 = arith.constant 8 : index
    %c0_60 = arith.constant 0 : index
    %93 = vector.load %arg2[%c8_59, %c0_60] : memref<16x512xf32, #tpu.memory_space<vmem>>, vector<2x512xf32>
    %94 = arith.mulf %92, %93 : vector<2x512xf32>
    %c10_61 = arith.constant 10 : index
    %c0_62 = arith.constant 0 : index
    %95 = vector.load %arg10[%c10_61, %c0_62] : memref<19x512xf32, #tpu.memory_space<vmem>>, vector<2x512xf32>
    tpu.vector_store %arg10[%c10_61, %c0_62], %94 {strides = array<i32>} : memref<19x512xf32, #tpu.memory_space<vmem>>, vector<2x512xf32>,
    %96 = vector.extract_strided_slice %64 {offsets = [0, 60], sizes = [2, 452], strides = [1, 1]} : vector<2x512xf32> to vector<2x452xf32>
    %97 = vector.extract_strided_slice %64 {offsets = [0, 0], sizes = [2, 60], strides = [1, 1]} : vector<2x512xf32> to vector<2x60xf32>
    %98 = tpu.concatenate %96, %97 in 1 : vector<2x452xf32>, vector<2x60xf32> -> vector<2x512xf32>
    %c10_63 = arith.constant 10 : index
    %c0_64 = arith.constant 0 : index
    %99 = vector.load %arg2[%c10_63, %c0_64] : memref<16x512xf32, #tpu.memory_space<vmem>>, vector<2x512xf32>
    %100 = arith.mulf %98, %99 : vector<2x512xf32>
    %c12_65 = arith.constant 12 : index
    %c0_66 = arith.constant 0 : index
    %101 = vector.load %arg10[%c12_65, %c0_66] : memref<19x512xf32, #tpu.memory_space<vmem>>, vector<2x512xf32>
    tpu.vector_store %arg10[%c12_65, %c0_66], %100 {strides = array<i32>} : memref<19x512xf32, #tpu.memory_space<vmem>>, vector<2x512xf32>,
    %102 = vector.extract_strided_slice %64 {offsets = [0, 64], sizes = [2, 448], strides = [1, 1]} : vector<2x512xf32> to vector<2x448xf32>
    %103 = vector.extract_strided_slice %64 {offsets = [0, 0], sizes = [2, 64], strides = [1, 1]} : vector<2x512xf32> to vector<2x64xf32>
    %104 = tpu.concatenate %102, %103 in 1 : vector<2x448xf32>, vector<2x64xf32> -> vector<2x512xf32>
    %c12_67 = arith.constant 12 : index
    %c0_68 = arith.constant 0 : index
    %105 = vector.load %arg2[%c12_67, %c0_68] : memref<16x512xf32, #tpu.memory_space<vmem>>, vector<2x512xf32>
    %106 = arith.mulf %104, %105 : vector<2x512xf32>
    %c14_69 = arith.constant 14 : index
    %c0_70 = arith.constant 0 : index
    %107 = vector.load %arg10[%c14_69, %c0_70] : memref<19x512xf32, #tpu.memory_space<vmem>>, vector<2x512xf32>
    tpu.vector_store %arg10[%c14_69, %c0_70], %106 {strides = array<i32>} : memref<19x512xf32, #tpu.memory_space<vmem>>, vector<2x512xf32>,
    %108 = vector.extract_strided_slice %64 {offsets = [0, 68], sizes = [2, 444], strides = [1, 1]} : vector<2x512xf32> to vector<2x444xf32>
    %109 = vector.extract_strided_slice %64 {offsets = [0, 0], sizes = [2, 68], strides = [1, 1]} : vector<2x512xf32> to vector<2x68xf32>
    %110 = tpu.concatenate %108, %109 in 1 : vector<2x444xf32>, vector<2x68xf32> -> vector<2x512xf32>
    %c14_71 = arith.constant 14 : index
    %c0_72 = arith.constant 0 : index
    %111 = vector.load %arg2[%c14_71, %c0_72] : memref<16x512xf32, #tpu.memory_space<vmem>>, vector<2x512xf32>
    %112 = arith.mulf %110, %111 : vector<2x512xf32>
    %c16_73 = arith.constant 16 : index
    %c0_74 = arith.constant 0 : index
    %113 = vector.load %arg10[%c16_73, %c0_74] : memref<19x512xf32, #tpu.memory_space<vmem>>, vector<2x512xf32>
    tpu.vector_store %arg10[%c16_73, %c0_74], %112 {strides = array<i32>} : memref<19x512xf32, #tpu.memory_space<vmem>>, vector<2x512xf32>,
    %c0_75 = arith.constant 0 : index
    %c0_76 = arith.constant 0 : index
    %114 = vector.load %arg6[%c0_75, %c0_76] : memref<2x19xf32, #tpu.memory_space<vmem>>, vector<2x19xf32>
    %c0_77 = arith.constant 0 : index
    %c0_78 = arith.constant 0 : index
    %115 = vector.load %arg10[%c0_77, %c0_78] : memref<19x512xf32, #tpu.memory_space<vmem>>, vector<19x512xf32>
    %cst_79 = arith.constant dense<0.000000e+00> : vector<2x512xf32>
    %116 = tpu.matmul %114, %115, %cst_79 {dimension_numbers = #tpu.dot_dimension_numbers<[1], [0], [0], [1], [0, 0, 1, 1], [], []>, precision = #tpu.contract_precision<fp32>} : vector<2x19xf32>, vector<19x512xf32>, vector<2x512xf32> -> vector<2x512xf32>
    %cst_80 = arith.constant 0.000000e+00 : f32
    %117 = vector.broadcast %cst_80 : f32 to vector<2x512xf32>
    %118 = arith.maximumf %116, %117 : vector<2x512xf32>
    %c0_81 = arith.constant 0 : index
    %119 = memref.load %arg7[%c0_81] : memref<2xf32, #tpu.memory_space<smem>>
    %120 = vector.extract_strided_slice %118 {offsets = [0, 0], sizes = [1, 512], strides = [1, 1]} : vector<2x512xf32> to vector<1x512xf32>
    %121 = vector.broadcast %119 : f32 to vector<1x512xf32>
    %122 = arith.mulf %121, %120 : vector<1x512xf32>
    %c1 = arith.constant 1 : index
    %123 = memref.load %arg7[%c1] : memref<2xf32, #tpu.memory_space<smem>>
    %124 = vector.extract_strided_slice %118 {offsets = [1, 0], sizes = [1, 512], strides = [1, 1]} : vector<2x512xf32> to vector<1x512xf32>
    %125 = vector.broadcast %123 : f32 to vector<1x512xf32>
    %126 = arith.mulf %125, %124 : vector<1x512xf32>
    %127 = arith.addf %122, %126 : vector<1x512xf32>
    %c0_82 = arith.constant 0 : index
    %128 = memref.load %arg8[%c0_82] : memref<1xf32, #tpu.memory_space<smem>>
    %129 = vector.broadcast %128 : f32 to vector<1x512xf32>
    %130 = arith.addf %127, %129 : vector<1x512xf32>
    %c0_83 = arith.constant 0 : index
    %c0_84 = arith.constant 0 : index
    %c0_85 = arith.constant 0 : index
    %131 = vector.load %arg9[%c0_83, %c0_84, %c0_85] : memref<1x1x512xf32, #tpu.memory_space<vmem>>, vector<1x1x512xf32>
    %132 = vector.shape_cast %131 : vector<1x1x512xf32> to vector<1x512xf32>
    %133 = vector.shape_cast %130 : vector<1x512xf32> to vector<1x1x512xf32>
    tpu.vector_store %arg9[%c0_83, %c0_84, %c0_85], %133 {strides = array<i32>} : memref<1x1x512xf32, #tpu.memory_space<vmem>>, vector<1x1x512xf32>,
    return
  }
  func.func @transform_0(%arg0: i32) -> (i32, i32, i32) {
    %c0_i32 = arith.constant 0 : i32
    %c0_i32_0 = arith.constant 0 : i32
    %c0_i32_1 = arith.constant 0 : i32
    return %arg0, %c0_i32, %c0_i32_0 : i32, i32, i32
  }
  func.func @transform_1(%arg0: i32) -> (i32, i32) {
    %c0_i32 = arith.constant 0 : i32
    %c0_i32_0 = arith.constant 0 : i32
    %c0_i32_1 = arith.constant 0 : i32
    return %c0_i32, %c0_i32_0 : i32, i32
  }
  func.func @transform_2(%arg0: i32) -> (i32, i32) {
    %c0_i32 = arith.constant 0 : i32
    %c0_i32_0 = arith.constant 0 : i32
    %c0_i32_1 = arith.constant 0 : i32
    return %c0_i32, %c0_i32_0 : i32, i32
  }
  func.func @transform_3(%arg0: i32) -> (i32, i32) {
    %c0_i32 = arith.constant 0 : i32
    %c0_i32_0 = arith.constant 0 : i32
    %c0_i32_1 = arith.constant 0 : i32
    return %c0_i32, %c0_i32_0 : i32, i32
  }
  func.func @transform_4(%arg0: i32) -> (i32, i32) {
    %c0_i32 = arith.constant 0 : i32
    %c0_i32_0 = arith.constant 0 : i32
    %c0_i32_1 = arith.constant 0 : i32
    return %c0_i32, %c0_i32_0 : i32, i32
  }
  func.func @transform_5(%arg0: i32) -> (i32, i32) {
    %c0_i32 = arith.constant 0 : i32
    %c0_i32_0 = arith.constant 0 : i32
    %c0_i32_1 = arith.constant 0 : i32
    return %c0_i32, %c0_i32_0 : i32, i32
  }
  func.func @transform_6(%arg0: i32) -> i32 {
    %c0_i32 = arith.constant 0 : i32
    %c0_i32_0 = arith.constant 0 : i32
    return %c0_i32 : i32
  }
  func.func @transform_7(%arg0: i32) -> i32 {
    %c0_i32 = arith.constant 0 : i32
    %c0_i32_0 = arith.constant 0 : i32
    return %c0_i32 : i32
  }
  func.func @transform_8(%arg0: i32) -> (i32, i32, i32) {
    %c0_i32 = arith.constant 0 : i32
    %c0_i32_0 = arith.constant 0 : i32
    %c0_i32_1 = arith.constant 0 : i32
    return %arg0, %c0_i32, %c0_i32_0 : i32, i32, i32
  }
}

</mosaic_0001>

<bundles_post_ra>
// kernel: tpu_custom_call.1
= control target key start
LH: loop header
LB: loop body
LE: loop exit
PB: predicated region body
PF: predicated region fallthrough
CT: control target
= control target key end

     0   :  { %s5973_s0 = inlined_call_operand.hbm [shape: f32[2,32,512], index: 0, kind: input, shape index: {}]   ;;  %s5974_s1 = inlined_call_operand.hbm [shape: f32[16,512], index: 1, kind: input, shape index: {}]   ;;  %s5975_s2 = inlined_call_operand.vmem [shape: f32[2,32], index: 2, kind: input, shape index: {}]   ;;  %s5976_s3 = inlined_call_operand.vmem [shape: f32[2,1], index: 3, kind: input, shape index: {}]   ;;  %s5977_s4 = inlined_call_operand.vmem [shape: f32[2,19], index: 4, kind: input, shape index: {}]   ;;  %s5978_s5 = inlined_call_operand.vmem [shape: f32[2,19], index: 5, kind: input, shape index: {}]   ;;  %s5979_s6 = inlined_call_operand.vmem [shape: f32[2], index: 6, kind: input, shape index: {}]   ;;  %s5980_s7 = inlined_call_operand.<no memory space> [shape: f32[1], index: 7, kind: input, shape index: {}]   ;;  %s5981_s8 = inlined_call_operand.hbm [shape: f32[2,1,512], index: 8, kind: output, shape index: {}]  }
   0x1   :  { %13 = sst [smem:[#allocation3]] %s5980_s7 }
   0x2   :  { %14 = vsyncpa [#allocation5], 0 }
   0x3   :  { %16 = vsyncpa [#allocation5 + $0x1], 0 }
   0x4   :  { %17 = vsyncpa [#allocation9], 0 }
   0x5   :  { %18 = vsyncpa [#allocation7], 0 }
   0x6   :  { %19 = vsyncpa [#allocation6], 0 }
   0x7   :  { %21 = vsyncpa [#allocation6 + $0x1], 0  ;;  %s5022_s29 = smov 0   ;;  %s5024_s30 = smov 0  }
   0x8   :  { %s5026_s9 = smov 0   ;;  %s5028_s10 = smov 0  }
   0x9 LB: > { %s5043_s7 = sadd.s32 4294967295, %s4957_s10   ;;  %s4454_s11 = sadd.s32 4294967294, %s4957_s10   ;;  %s4957_s10 = sphi %s5028_s10, %s6007_s10   ;;  %s4953_s9 = sphi %s5026_s9, %s6006_s9   ;;  %s4949_s30 = sphi %s5024_s30, %s6005_s30   ;;  %s4945_s29 = sphi %s5022_s29, %s6004_s29  }
   0xa   : > { %p47_p0 = scmp.ne.s32.totalorder %s4949_s30, %s4945_s29  ;;  %p5982_p1 = scmp.eq.s32.totalorder %s5043_s7, 0 }
   0xb   : > { %p224_p3 = scmp.eq.s32.totalorder %s4454_s11, 1  ;;  %p4455_p5 = scmp.ge.s32.totalorder %s4957_s10, 1 }
   0xc   : > { %p5052_p4 = por %p5982_p1, %p47_p0  ;;  %p231_p7 = scmp.lt.s32.totalorder %s4957_s10, 3 }
   0xd   : > { %p5057_p6 = por %p224_p3, %p47_p0  ;;  %s4959_s15 = smov [#allocation8]  }
   0xe   : > { %s5986_s12 = scalar_select %p5052_p4, 1, 0 }
   0xf   : > { %s5987_s13 = scalar_select %p5057_p6, 1, 0 }
  0x10   : > { %p5062_p8 = pnand %p4455_p5, %p231_p7  ;;  %s243_s16 = sshll.u32 %s4959_s15, 4  ;;  %s244_s16 = int_to_ptr.vmem [resolvable:$true] %s243_s16 }
  0x11   : > { %s269_s19 = sshll.u32 %s5979_s6, 4  ;;  %s4810_s23 = scalar_lea.hbm %s5974_s1, 1024  ;;  %s5078_s19 = int_to_ptr.vmem [resolvable:$true] %s269_s19 }
  0x12   : > { %s5988_s14 = scalar_select %p5062_p8, 1, 0 }
  0x13   : > { %p4743_p9 = pneg %p5062_p8  ;;  %p4811_p12 = scmp.ne.s32.totalorder %s5974_s1, %s4810_s23 }
  0x14   : > { %p4817_p5 = scmp.lt.u32.totalorder %s4810_s23, %s5974_s1 }
  0x15   : > { %p5074_p11 = pnand %p4743_p9, %p5982_p1 }
  0x17   : > { %p4812_p13 = pneg %p5074_p11 }
  0x19   : > { %p4813_p0 = pnand %p4812_p13, %p4811_p12 }
  0x1b   : > { %p4814_p3 = pneg %p4813_p0 }
  0x1d   : > { %p4819_p7 = pnand %p4817_p5, %p4814_p3 }
  0x1f   : > { %4822 = shalt.err (!%p4819_p7)
}
  0x20   : > { %s4823_s28 = scalar_lea.vmem %s244_s16, 1024  ;;  %p4831_p2 = scmp.lt.s32.totalorder %s244_s16, %s244_s16 }
  0x21   : > { %p4824_p9 = scmp.ne.s32.totalorder %s244_s16, %s4823_s28  ;;  %p4832_p6 = scmp.lt.s32.totalorder %s4823_s28, %s4823_s28 }
  0x23   : > { %p4826_p10 = pnand %p4824_p9, %p4812_p13  ;;  %p4833_p4 = por %p4832_p6, %p4831_p2 }
  0x25   : > { %p4827_p1 = pneg %p4826_p10 }
  0x27   : > { %p4834_p8 = pnand %p4833_p4, %p4827_p1 }
  0x29   : > { %4837 = shalt.err (!%p4834_p8)
}
  0x2a   : > { %s5985_s11 = smov 512   ;;  %s4961_s15 = smov 32  }
  0x2b   : > { %4746 = dma.hbm_to_vmem [thread:$0]  (!%p5074_p11), %s5974_s1, 1024, %s244_s16, [#allocation9], %s5985_s11, %s5985_s11, %s4961_s15  }
  0x2c   : > { %s4838_s21 = scalar_lea.vmem %s5078_s19, 16  ;;  %p4846_p4 = scmp.lt.s32.totalorder %s5078_s19, %s5078_s19 }
  0x2d   : > { %p4839_p10 = scmp.ne.s32.totalorder %s5078_s19, %s4838_s21  ;;  %p4847_p6 = scmp.lt.s32.totalorder %s4838_s21, %s4838_s21 }
  0x2f   : > { %p4841_p1 = pnand %p4839_p10, %p4812_p13  ;;  %p4848_p8 = por %p4847_p6, %p4846_p4 }
  0x31   : > { %p4842_p2 = pneg %p4841_p1 }
  0x33   : > { %p4849_p12 = pnand %p4848_p8, %p4842_p2 }
  0x35   : > { %4852 = shalt.err (!%p4849_p12)
}
  0x36   : > { %s4962_s22 = smov [#allocation10]   ;;  %s5116_s16 = sadd.s32 1, %s4957_s10  }
  0x37   : > { %4749 = dma.vmem_to_smem (!%p5074_p11), %s5078_s19, 16, %s4962_s22, [#allocation7]  }
  0x38   : > { %s34_s23 = sadd.s32 1, %s4953_s9  ;;  %s31_s24 = ssub.s32 %s4957_s10, %s5116_s16 }
  0x39   : > { %p41_p13 = scmp.ne.s32.totalorder %s4953_s9, %s4949_s30  ;;  %p32_p0 = scmp.eq.s32.totalorder %s31_s24, 0 }
  0x3a   : > { %p42_p3 = scmp.eq.s32.totalorder %s4957_s10, 0  ;;  %p5990_p5 = scmp.eq.s32.totalorder %s5043_s7, 1 }
  0x3b   : > { %p4760_p9 = scmp.lt.s32.totalorder %s4957_s10, 2  ;;  %s283_s26 = sand.u32 1, %s4953_s9  }
  0x3c   : > { %p5126_p7 = por %p5990_p5, %p41_p13  ;;  %p43_p10 = por %p42_p3, %p41_p13 }
  0x3d   : > { %s5132_s25 = scalar_select %p32_p0, %s4953_s9, %s34_s23  }
  0x3e   : > { %s4459_s27 = sshll.u32 %s283_s26, 7  ;;  %s4473_s19 = sshll.u32 %s4957_s10, 11 }
  0x3f   : > { %s5139_s18 = scalar_lea.hbm %s5973_s0, %s4473_s19  ;;  %s287_s21 = scalar_lea.vmem [#allocation4], %s4459_s27 }
  0x40   : > { %s294_s22 = sshll.u32 %s287_s21, 4  ;;  %p5143_p11 = pnand %p4760_p9, %p43_p10  ;;  %s5141_s22 = int_to_ptr.vmem [resolvable:$true] %s294_s22 }
  0x41   : > { %s5147_s24 = scalar_lea.sflag [#allocation5], %s283_s26  ;;  %s4853_s11 = scalar_lea.hbm %s5139_s18, 2048 }
  0x42   : > { %p4854_p1 = scmp.ne.s32.totalorder %s5139_s18, %s4853_s11  ;;  %p4855_p2 = pneg %p5143_p11 }
  0x43   : > { %s4858_s28 = scalar_lea.hbm %s5973_s0, 4096  ;;  %p4859_p8 = scmp.lt.u32.totalorder %s5139_s18, %s5973_s0 }
  0x44   : > { %p4856_p4 = pnand %p4855_p2, %p4854_p1  ;;  %p4860_p12 = scmp.lt.u32.totalorder %s4858_s28, %s4853_s11 }
  0x45   : > { %p4862_p0 = scmp.lt.u32.totalorder %s4853_s11, %s5139_s18 }
  0x46   : > { %p4857_p6 = pneg %p4856_p4  ;;  %p4861_p13 = por %p4860_p12, %p4859_p8 }
  0x48   : > { %p4863_p3 = por %p4862_p0, %p4861_p13 }
  0x4a   : > { %p4864_p5 = pnand %p4863_p3, %p4857_p6 }
  0x4c   : > { %4867 = shalt.err (!%p4864_p5)
}
  0x4d   : > { %s4868_s26 = scalar_lea.vmem %s5141_s22, 2048  ;;  %s4963_s27 = smov [#allocation4]  }
  0x4e   : > { %p4869_p9 = scmp.ne.s32.totalorder %s5141_s22, %s4868_s26  ;;  %s4873_s19 = sshll.u32 %s4963_s27, 4  ;;  %s4874_s19 = int_to_ptr.vmem [resolvable:$false] %s4873_s19 }
  0x4f   : > { %s4875_s17 = scalar_lea.vmem %s4874_s19, 4096  ;;  %p4876_p4 = scmp.lt.s32.totalorder %s5141_s22, %s4874_s19 }
  0x50   : > { %p4871_p10 = pnand %p4869_p9, %p4855_p2  ;;  %p4877_p8 = scmp.lt.s32.totalorder %s4875_s17, %s4868_s26 }
  0x52   : > { %p4872_p1 = pneg %p4871_p10  ;;  %p4878_p12 = por %p4877_p8, %p4876_p4 }
  0x54   : > { %p4879_p13 = pnand %p4878_p12, %p4872_p1 }
  0x56   : > { %4882 = shalt.err (!%p4879_p13)
}
  0x57   : > { %s5993_s11 = smov 512   ;;  %p5994_p2 = scmp.ne.s32.totalorder %s5988_s14, 0 }
  0x58   : > { %4753 = dma.hbm_to_vmem [thread:$0]  (!%p5143_p11), %s5139_s18, 2048, %s5141_s22, %s5147_s24, %s5993_s11, %s5993_s11, %s4961_s15  }
  0x59   : > { %306 = sbr.rel (%p5994_p2) target bundleno = 1274 (0x4fa), region = 52  ;;  %s5181_s28 = sand.u32 (!%p5994_p2), 1, %s4949_s30  }
  0x5a   : > { %s4463_s21 = sshll.u32 (!%p5994_p2), %s5181_s28, 7  ;;  %s309_s26 = scalar_lea.sflag (!%p5994_p2), [#allocation5], %s5181_s28 }
  0x5b   : > { %s5185_s27 = scalar_lea.vmem (!%p5994_p2), [#allocation4], %s4463_s21  ;;  %p5995_p6 = scmp.ne.s32.totalorder (!%p5994_p2), %s5986_s12, 0 }
  0x60   : > { %4928 = dma.done.wait (%p5995_p6), %s309_s26, 2048  }
  0x61   : > { %4930 = vsyncadd (%p5995_p6), %s309_s26, 4294965248  ;;  %p5996_p11 = scmp.eq.s32.totalorder %s5043_s7, 0 }
  0x63   : > { %4932 = dma.done.wait (%p5996_p11), [#allocation9], 1024   ;;  %p5997_p0 = pmov %p5996_p11 }
  0x65   : > { %4934 = vsyncadd (%p5997_p0), [#allocation9], 4294966272  ;;  %p5998_p3 = pmov %p5997_p0 }
  0x66   : > { %p5999_p5 = pmov %p5997_p0 }
  0x67   : > { %4936 = dma.done.wait (%p5998_p3), [#allocation7], 16  }
  0x68   : > { %4938 = vsyncadd (%p5999_p5), [#allocation7], 4294967280 }
  0x69   : > { %325 = sfence }
  0x6a   : > { %v356_v0 = vld [vmem:[%s5185_s27 + $0x8] sm:$0xff]  ;;  %v358_v2 = vld [vmem:[%s5185_s27 + $0x18] sm:$0xff]  ;;  %vm377_vm0 = vcmask 261120   ;;  %v355_v7 = vld [vmem:[%s5185_s27] sm:$0xff]  ;;  %v4964_v9 = vmov 0.0   ;;  %v4965_v16 = vmov 0  }
  0x6b   : > { %v360_v1 = vld [vmem:[%s5185_s27 + $0x28] sm:$0xff]  ;;  %v381_v3 = vand.u32 4294901760, %v356_v0  ;;  %v362_v5 = vld [vmem:[%s5185_s27 + $0x38] sm:$0xff]  ;;  %v924_v6 = vand.u32 4294901760, %v358_v2  ;;  %v359_v8 = vld [vmem:[%s5185_s27 + $0x20] sm:$0xff]  ;;  %453 = vmatprep.mubr.f32.mxu0 %v4964_v9  ;;  %996 = vmatprep.mubr.f32.mxu1 %v4964_v9  ;;  %v383_v11 = vand.u32 4294901760, %v355_v7 }
  0x6c   : > { %v385_v4 = vand.u32 4294901760, %v360_v1  ;;  %v928_v10 = vand.u32 4294901760, %v362_v5  ;;  %v387_v12 = vand.u32 4294901760, %v359_v8  ;;  %v357_v13 = vld [vmem:[%s5185_s27 + $0x10] sm:$0xff]  ;;  %v364_v15 = vld [vmem:[%s5185_s27 + $0x48] sm:$0xff]  ;;  %4809 = vset.pattern.permute.xlu0 %v4965_v16  ;;  %v366_v22 = vld [vmem:[%s5185_s27 + $0x58] sm:$0xff] }
  0x6d   : > { %v361_v14 = vld [vmem:[%s5185_s27 + $0x30] sm:$0xff]  ;;  %v5212_v18 = vsub.f32 %v356_v0, %v381_v3  ;;  %v5216_v20 = vsub.f32 %v358_v2, %v924_v6  ;;  %v368_v21 = vld [vmem:[%s5185_s27 + $0x68] sm:$0xff]  ;;  %v370_v23 = vld [vmem:[%s5185_s27 + $0x78] sm:$0xff]  ;;  %v5227_v27 = vsub.f32 %v355_v7, %v383_v11  ;;  %v926_v30 = vand.u32 4294901760, %v357_v13  ;;  %s4966_s22 = smov 68   ;;  %s4967_s23 = smov 124  }
  0x6e   : > { %v5210_v17 = vpack.c.bf16 %v385_v4, %v381_v3  ;;  %v5214_v19 = vsub.f32 %v360_v1, %v385_v4  ;;  %v5221_v24 = vpack.c.bf16 %v928_v10, %v924_v6  ;;  %v5223_v25 = vsub.f32 %v362_v5, %v928_v10  ;;  %v363_v28 = vld [vmem:[%s5185_s27 + $0x40] sm:$0xff]  ;;  %v365_v34 = vld [vmem:[%s5185_s27 + $0x50] sm:$0xff]  ;;  %s4968_s24 = smov 64   ;;  %s4969_s19 = smov 60  }
  0x6f   : > { %v5225_v26 = vpack.c.bf16 %v387_v12, %v383_v11  ;;  %v5231_v29 = vsub.f32 %v359_v8, %v387_v12  ;;  %v930_v31 = vand.u32 4294901760, %v361_v14  ;;  %v389_v32 = vand.u32 4294901760, %v364_v15  ;;  %v367_v33 = vld [vmem:[%s5185_s27 + $0x60] sm:$0xff]  ;;  %v369_v44 = vld [vmem:[%s5185_s27 + $0x70] sm:$0xff]  ;;  %s4971_s17 = smov 4   ;;  %s4467_s12 = sld [smem:[#allocation10 + $0x1]] }
  0x70   : > { %4476 = vmatprep.subr.bf16.mxu0 %v5210_v17  ;;  %4524 = vmatprep.subr.bf16.mxu1 %v5221_v24  ;;  %v393_v35 = vand.u32 4294901760, %v368_v21  ;;  %v932_v36 = vand.u32 4294901760, %v366_v22  ;;  %v936_v37 = vand.u32 4294901760, %v370_v23  ;;  %v391_v38 = vand.u32 4294901760, %v363_v28  ;;  %v371_v39 = vld [vmem:[%s5976_s3] sm:$0x3] }
  0x71   : > { %4478 = vmatpush1.bf16.msra.mxu0 %v5225_v26  ;;  %v5240_v40 = vpack.c.bf16 %v930_v31, %v926_v30  ;;  %v5242_v41 = vsub.f32 %v357_v13, %v926_v30  ;;  %v5244_v42 = vsub.f32 %v361_v14, %v930_v31  ;;  %v5246_v43 = vsub.f32 %v364_v15, %v389_v32  ;;  %v354_v45 = vld [vmem:[%s5975_s2] sm:$0x3]  ;;  %s4283_s14 = sld [smem:[#allocation10]]  ;;  %s4466_s18 = sshll.u32 %s5181_s28, 2 }
  0x72   : > { %374 = vperm.xlu0 %4809, %v371_v39   ;;  %v5252_v46 = vpack.c.bf16 %v393_v35, %v389_v32  ;;  %v5254_v47 = vsub.f32 %v368_v21, %v393_v35  ;;  %v5256_v48 = vpack.c.bf16 %v936_v37, %v932_v36  ;;  %v5258_v49 = vsub.f32 %v366_v22, %v932_v36  ;;  %s4311_s15 = sld [smem:[#allocation3]]  ;;  %s4348_s21 = scalar_lea.sflag [#allocation6], %s5181_s28 }
  0x73   : > { %4526 = vmatpush1.bf16.msra.mxu1 %v5240_v40  ;;  %v5261_v50 = vsub.f32 %v370_v23, %v936_v37  ;;  %v395_v51 = vand.u32 4294901760, %v367_v33  ;;  %v5263_v52 = vsub.f32 %v363_v28, %v391_v38  ;;  %v934_v53 = vand.u32 4294901760, %v365_v34 }
  0x74   : > { %4480 = vmatprep.subr.bf16.mxu0 %v5252_v46  ;;  %4528 = vmatprep.subr.bf16.mxu1 %v5256_v48  ;;  %v938_v54 = vand.u32 4294901760, %v369_v44  ;;  %v379_v55 = vsel %vm377_vm0, %v354_v45, 0  ;;  %v467_v56 = vand.u32 4294901760, %v5212_v18  ;;  %v479_v57 = vand.u32 4294901760, %v5214_v19 }
  0x75   : > { %v5270_v58 = vpack.c.bf16 %v395_v51, %v391_v38  ;;  %v5272_v59 = vsub.f32 %v367_v33, %v395_v51  ;;  %v5274_v60 = vsub.f32 %v365_v34, %v934_v53  ;;  %v5276_v61 = vand.u32 4294901760, %v379_v55 }
  0x76   : > { %v5278_v62 = vpack.c.bf16 %v938_v54, %v934_v53  ;;  %v5280_v63 = vsub.f32 %v369_v44, %v938_v54  ;;  %v468_v0 = vsub.f32 %v5212_v18, %v467_v56  ;;  %v480_v1 = vsub.f32 %v5214_v19, %v479_v57 }
  0x77   : > { %4482 = vmatpush1.bf16.msra.mxu0 %v5270_v58  ;;  %v5290_v2 = vsub.f32 %v379_v55, %v5276_v61  ;;  %v1010_v3 = vand.u32 4294901760, %v5216_v20  ;;  %v1022_v4 = vand.u32 4294901760, %v5223_v25  ;;  %v473_v5 = vand.u32 4294901760, %v5227_v27 }
  0x78   : > { %4530 = vmatpush1.bf16.msra.mxu1 %v5278_v62  ;;  %v469_v6 = vand.u32 4294901760, %v468_v0  ;;  %v481_v7 = vand.u32 4294901760, %v480_v1  ;;  %v485_v8 = vand.u32 4294901760, %v5231_v29  ;;  %v1016_v10 = vand.u32 4294901760, %v5242_v41 }
  0x79   : > { %v5299_v11 = vand.u32 4294901760, %v5290_v2  ;;  %v1011_v12 = vsub.f32 %v5216_v20, %v1010_v3  ;;  %v1023_v13 = vsub.f32 %v5223_v25, %v1022_v4  ;;  %v474_v14 = vsub.f32 %v5227_v27, %v473_v5 }
  0x7a   : > { %v4483_v15 = vpack.c.bf16 %v481_v7, %v469_v6  ;;  %v486_v16 = vsub.f32 %v5231_v29, %v485_v8  ;;  %v1017_v21 = vsub.f32 %v5242_v41, %v1016_v10  ;;  %v1028_v22 = vand.u32 4294901760, %v5244_v42 }
  0x7b   : > { %v457_v23 = vsub.f32 %v5290_v2, %v5299_v11  ;;  %v1012_v28 = vand.u32 4294901760, %v1011_v12  ;;  %v1024_v30 = vand.u32 4294901760, %v1023_v13  ;;  %v475_v31 = vand.u32 4294901760, %v474_v14 }
  0x7c   : > { %4484 = vmatprep.subr.bf16.mxu0 %v4483_v15  ;;  %v487_v32 = vand.u32 4294901760, %v486_v16  ;;  %v1018_v33 = vand.u32 4294901760, %v1017_v21  ;;  %v1029_v34 = vsub.f32 %v5244_v42, %v1028_v22  ;;  %v491_v35 = vand.u32 4294901760, %v5246_v43 }
  0x7d   : > { %v458_v36 = vand.u32 4294901760, %v457_v23  ;;  %v4531_v37 = vpack.c.bf16 %v1024_v30, %v1012_v28  ;;  %v503_v38 = vand.u32 4294901760, %v5254_v47  ;;  %v1034_v39 = vand.u32 4294901760, %v5258_v49 }
  0x7e   : > { %v4485_v44 = vpack.c.bf16 %v487_v32, %v475_v31  ;;  %v1030_v45 = vand.u32 4294901760, %v1029_v34  ;;  %v492_v51 = vsub.f32 %v5246_v43, %v491_v35  ;;  %v1046_v53 = vand.u32 4294901760, %v5261_v50 }
  0x7f   : > { %459 = vmatmul.mubr.f32.vlgmr.msra.gmra.mrb[0].mxu0 %v458_v36  ;;  %1002 = vmatmul.mubr.f32.vlgmr.msra.gmra.mrb[0].mxu1 %v458_v36  ;;  %v504_v54 = vsub.f32 %v5254_v47, %v503_v38  ;;  %v1035_v55 = vsub.f32 %v5258_v49, %v1034_v39  ;;  %v497_v0 = vand.u32 4294901760, %v5263_v52  ;;  %v509_v1 = vand.u32 4294901760, %v5272_v59 }
  0x80   : > { %4532 = vmatprep.subr.bf16.mxu1 %v4531_v37  ;;  %4486 = vmatpush1.bf16.msra.mxu0 %v4485_v44  ;;  %v4533_v6 = vpack.c.bf16 %v1030_v45, %v1018_v33  ;;  %v493_v7 = vand.u32 4294901760, %v492_v51  ;;  %v1047_v12 = vsub.f32 %v5261_v50, %v1046_v53  ;;  %v1040_v13 = vand.u32 4294901760, %v5274_v60 }
  0x81   : > { %v505_v14 = vand.u32 4294901760, %v504_v54  ;;  %v1036_v15 = vand.u32 4294901760, %v1035_v55  ;;  %v498_v16 = vsub.f32 %v5263_v52, %v497_v0  ;;  %v510_v21 = vsub.f32 %v5272_v59, %v509_v1  ;;  %569 = vmatprep.mubr.f32.mxu0 %v4964_v9  ;;  %1112 = vmatprep.mubr.f32.mxu1 %v4964_v9 }
  0x82   : > { %4534 = vmatpush1.bf16.msra.mxu1 %v4533_v6  ;;  %v1048_v23 = vand.u32 4294901760, %v1047_v12  ;;  %v1041_v28 = vsub.f32 %v5274_v60, %v1040_v13  ;;  %v1052_v30 = vand.u32 4294901760, %v5280_v63  ;;  %v4491_v44 = vpack.c.bf16 %v5214_v19, %v5212_v18 }
  0x83   : > { %v4487_v31 = vpack.c.bf16 %v505_v14, %v493_v7  ;;  %v499_v32 = vand.u32 4294901760, %v498_v16  ;;  %v511_v33 = vand.u32 4294901760, %v510_v21  ;;  %v4539_v54 = vpack.c.bf16 %v5223_v25, %v5216_v20 }
  0x84   : > { %v4535_v34 = vpack.c.bf16 %v1048_v23, %v1036_v15  ;;  %v1042_v36 = vand.u32 4294901760, %v1041_v28  ;;  %v1053_v37 = vsub.f32 %v5280_v63, %v1052_v30  ;;  %v4493_v55 = vpack.c.bf16 %v5231_v29, %v5227_v27 }
  0x85   : > { %4488 = vmatprep.subr.bf16.mxu0 %v4487_v31  ;;  %v4489_v45 = vpack.c.bf16 %v511_v33, %v499_v32  ;;  %v4495_v7 = vpack.c.bf16 %v5254_v47, %v5246_v43  ;;  %v4541_v12 = vpack.c.bf16 %v5244_v42, %v5242_v41  ;;  %v4543_v14 = vpack.c.bf16 %v5261_v50, %v5258_v49 }
  0x86   : > { %4536 = vmatprep.subr.bf16.mxu1 %v4535_v34  ;;  %v1054_v51 = vand.u32 4294901760, %v1053_v37  ;;  %v4497_v15 = vpack.c.bf16 %v5272_v59, %v5263_v52  ;;  %v4545_v16 = vpack.c.bf16 %v5280_v63, %v5274_v60  ;;  %v4507_v63 = vpack.c.bf16 %v479_v57, %v467_v56  ;;  %v1756_v37 = vld [vmem:[#allocation8 + $0x20] sm:$0x30] }
  0x87   : > { %4490 = vmatpush1.bf16.msra.mxu0 %v4489_v45  ;;  %v4555_v21 = vpack.c.bf16 %v1022_v4, %v1010_v3  ;;  %v4509_v18 = vpack.c.bf16 %v485_v8, %v473_v5  ;;  %v4511_v19 = vpack.c.bf16 %v503_v38, %v491_v35  ;;  %v4557_v20 = vpack.c.bf16 %v1028_v22, %v1016_v10  ;;  %v1530_v3 = vld [vmem:[#allocation8] sm:$0xc]  ;;  %v1533_v4 = vld [vmem:[#allocation8 + $0x18] sm:$0xc]  ;;  %v1758_v10 = vld [vmem:[#allocation8 + $0x30] sm:$0x30] }
  0x88   : > { %v4537_v6 = vpack.c.bf16 %v1054_v51, %v1042_v36  ;;  %4492 = vmatprep.subr.bf16.mxu0 %v4491_v44  ;;  %v4559_v25 = vpack.c.bf16 %v1046_v53, %v1034_v39  ;;  %v4513_v27 = vpack.c.bf16 %v509_v1, %v497_v0  ;;  %v4561_v29 = vpack.c.bf16 %v1052_v30, %v1040_v13  ;;  %v1501_v35 = vld [vmem:[#allocation8 + $0x8] sm:$0x3]  ;;  %v1502_v38 = vld [vmem:[#allocation8 + $0x10] sm:$0x3]  ;;  %v1531_v1 = vld [vmem:[#allocation8 + $0x8] sm:$0xc] }
  0x89   : > { %v1471_v56 = vlaneseq  ;;  %vm1491_vm2 = vcmask 556032   ;;  %vm1521_vm3 = vcmask 523264   ;;  %v1538_v53 = vrot.slane %v1530_v3, 2  ;;  %v1532_v13 = vld [vmem:[#allocation8 + $0x10] sm:$0xc] }
  0x8a   : > { %4538 = vmatpush1.bf16.msra.mxu1 %v4537_v6  ;;  %571 = vmatmul.mubr.f32.vlgmr.msra.gmra.mrb[0].mxu0 %v5276_v61  ;;  %v1541_v0 = vrot.slane %v1533_v4, 2  ;;  %v1766_v30 = vrot.slane %v1758_v10, 4  ;;  %v1757_v44 = vld [vmem:[#allocation8 + $0x28] sm:$0x30]  ;;  %v1539_v51 = vrot.slane %v1531_v1, 2  ;;  %vm1575_vm4 = vcmask 490496  }
  0x8b   : > { %4540 = vmatprep.subr.bf16.mxu1 %v4539_v54  ;;  %4494 = vmatpush1.bf16.msra.mxu0 %v4493_v55  ;;  %vm5444_vm1 = vcmp.lt.s32.totalorder %v1471_v56, 512  ;;  %v1540_v54 = vrot.slane %v1532_v13, 2  ;;  %vm1629_vm5 = vcmask 31744   ;;  %vm1829_vm6 = vcmask 154624  }
  0x8c   : > { %4496 = vmatprep.subr.bf16.mxu0 %v4495_v7  ;;  %657 = vmatprep.mubr.f32.mxu0 %v4964_v9  ;;  %vm1686_vm7 = vcmask 1014784   ;;  %vm1833_vm8 = vcmask 1042432  }
  0x8d   : > { %1114 = vmatmul.mubr.f32.vlgmr.msra.gmra.mrb[0].mxu1 %v5276_v61 }
  0x8e   : > { %4542 = vmatpush1.bf16.msra.mxu1 %v4541_v12  ;;  %1200 = vmatprep.mubr.f32.mxu1 %v4964_v9  ;;  %v1584_v12 = vld [vmem:[#allocation8] sm:$0x30] }
  0x8f   : > { %4544 = vmatprep.subr.bf16.mxu1 %v4543_v14  ;;  %4498 = vmatpush1.bf16.msra.mxu0 %v4497_v15  ;;  %v1587_v14 = vld [vmem:[#allocation8 + $0x18] sm:$0x30] }
  0x90   : > { %4500 = vmatprep.subr.bf16.mxu0 %v5210_v17 }
  0x92   : > { %4546 = vmatpush1.bf16.msra.mxu1 %v4545_v16  ;;  %660 = vmatmul.mubr.f32.vlgmr.msra.gmra.mrb[0].mxu0 %v5290_v2 }
  0x93   : > { %4548 = vmatprep.subr.bf16.mxu1 %v5221_v24  ;;  %4502 = vmatpush1.bf16.msra.mxu0 %v5225_v26 }
  0x94   : > { %4504 = vmatprep.subr.bf16.mxu0 %v5252_v46  ;;  %738 = vmatprep.mubr.f32.mxu0 %v4964_v9 }
  0x95   : > { %1203 = vmatmul.mubr.f32.vlgmr.msra.gmra.mrb[0].mxu1 %v5290_v2 }
  0x96   : > { %4550 = vmatpush1.bf16.msra.mxu1 %v5240_v40  ;;  %1281 = vmatprep.mubr.f32.mxu1 %v4964_v9 }
  0x97   : > { %4552 = vmatprep.subr.bf16.mxu1 %v5256_v48  ;;  %4506 = vmatpush1.bf16.msra.mxu0 %v5270_v58 }
  0x98   : > { %4508 = vmatprep.subr.bf16.mxu0 %v4507_v63  ;;  %v1764_v63 = vrot.slane %v1756_v37, 4 }
  0x9a   : > { %4554 = vmatpush1.bf16.msra.mxu1 %v5278_v62  ;;  %742 = vmatmul.mubr.f32.vlgmr.msra.gmra.mrb[0].mxu0 %v5299_v11 }
  0x9b   : > { %4556 = vmatprep.subr.bf16.mxu1 %v4555_v21  ;;  %4510 = vmatpush1.bf16.msra.mxu0 %v4509_v18  ;;  %v1765_v21 = vrot.slane %v1757_v44, 4 }
  0x9c   : > { %4512 = vmatprep.subr.bf16.mxu0 %v4511_v19  ;;  %836 = vmatprep.mubr.f32.mxu0 %v4964_v9 }
  0x9d   : > { %1285 = vmatmul.mubr.f32.vlgmr.msra.gmra.mrb[0].mxu1 %v5299_v11  ;;  %v1759_v11 = vld [vmem:[#allocation8 + $0x38] sm:$0x30] }
  0x9e   : > { %4558 = vmatpush1.bf16.msra.mxu1 %v4557_v20  ;;  %1379 = vmatprep.mubr.f32.mxu1 %v4964_v9  ;;  %v1767_v31 = vrot.slane %v1759_v11, 4 }
  0x9f   : > { %4560 = vmatprep.subr.bf16.mxu1 %v4559_v25  ;;  %4514 = vmatpush1.bf16.msra.mxu0 %v4513_v27  ;;  %v1794_v27 = vld [vmem:[#allocation8 + $0x30] sm:$0xc0] }
  0xa0   : > { %4516 = vmatprep.subr.bf16.mxu0 %v5210_v17 }
  0xa2   : > { %4562 = vmatpush1.bf16.msra.mxu1 %v4561_v29  ;;  %838 = vmatmul.mubr.f32.vlgmr.msra.gmra.mrb[0].mxu0 %v5276_v61  ;;  %v1795_v29 = vld [vmem:[#allocation8 + $0x38] sm:$0xc0] }
  0xa3   : > { %4564 = vmatprep.subr.bf16.mxu1 %v5221_v24  ;;  %4518 = vmatpush1.bf16.msra.mxu0 %v5225_v26 }
  0xa4   : > { %4520 = vmatprep.subr.bf16.mxu0 %v5252_v46  ;;  %916 = vmatprep.mubr.f32.mxu0 %v4964_v9 }
  0xa5   : > { %1381 = vmatmul.mubr.f32.vlgmr.msra.gmra.mrb[0].mxu1 %v5276_v61 }
  0xa6   : > { %4566 = vmatpush1.bf16.msra.mxu1 %v5240_v40  ;;  %1459 = vmatprep.mubr.f32.mxu1 %v4964_v9 }
  0xa7   : > { %4568 = vmatprep.subr.bf16.mxu1 %v5256_v48  ;;  %4522 = vmatpush1.bf16.msra.mxu0 %v5270_v58  ;;  %v4970_v58 = vmov 1.0  }
  0xa8   : > { %1476 = vst.msk [vmem:[#allocation2 + $0x42] ss:$8 sm:$0xf] %vm5444_vm1, %v4970_v58  ;;  %v1803_v58 = vrot.slane %v1795_v29, 6 }
  0xaa   : > { %4570 = vmatpush1.bf16.msra.mxu1 %v5278_v62  ;;  %918 = vmatmul.mubr.f32.vlgmr.msra.gmra.mrb[0].mxu0 %v5276_v61  ;;  %v1721_v62 = vld [vmem:[#allocation8 + $0x28] sm:$0xc] }
  0xab   : > { %1916 = vmatprep.mubr.f32.mxu0 %v4964_v9  ;;  %v1729_v8 = vrot.slane %v1721_v62, 2 }
  0xad   : > { %1461 = vmatmul.mubr.f32.vlgmr.msra.gmra.mrb[0].mxu1 %v5276_v61  ;;  %v1720_v61 = vld [vmem:[#allocation8 + $0x20] sm:$0xc] }
  0xae   : > { %2433 = vmatprep.mubr.f32.mxu1 %v4964_v9  ;;  %v1728_v5 = vrot.slane %v1720_v61, 2 }
  0xf1   : > { %v375_v17 = vpop.permute.xlu0 %374 }
 0x17d   : > { %v919_v24 = vpop.f32.mrb[0].mxu0 }
 0x17e   : > { %v4667_v26 = vadd.f32 %v919_v24, %v375_v17  ;;  %v921_v40 = vpop.f32.mrb[1].mxu0  ;;  %v1592_v24 = vrot.slane %v1584_v12, 4  ;;  %v1816_v12 = vld [vmem:[%s5977_s4] sm:$0x3] }
 0x17f   : > { %v4668_v41 = vadd.f32 %v921_v40, %v375_v17  ;;  %v1585_v40 = vld [vmem:[#allocation8 + $0x8] sm:$0x30] }
 0x180   : > { %v1467_v42 = vmax.f32 %v4667_v26, 0.0  ;;  %v1462_v43 = vpop.f32.mrb[0].mxu1  ;;  %v1595_v26 = vrot.slane %v1587_v14, 4  ;;  %v1593_v11 = vrot.slane %v1585_v40, 4 }
 0x181   : > { %v4669_v46 = vadd.f32 %v1462_v43, %v375_v17  ;;  %v1468_v47 = vmax.f32 %v4668_v41, 0.0  ;;  %v1464_v48 = vpop.f32.mrb[1].mxu1 }
 0x182   : > { %1674 = vst [vmem:[#allocation2 + $0x20] sm:$0x3] %v1467_v42  ;;  %v4670_v49 = vadd.f32 %v1464_v48, %v375_v17  ;;  %1485 = vrot.lane.b32.xlu1 %v1467_v42, %s4966_s22  ;;  %v1586_v48 = vld [vmem:[#allocation8 + $0x10] sm:$0x30] }
 0x183   : > { %v1469_v50 = vmax.f32 %v4669_v46, 0.0  ;;  %1675 = vst [vmem:[#allocation2 + $0x28] sm:$0x3] %v1468_v47 }
 0x184   : > { %v1470_v52 = vmax.f32 %v4670_v49, 0.0 }
 0x185   : > { %1676 = vst [vmem:[#allocation2 + $0x30] sm:$0x3] %v1469_v50  ;;  %1489 = vrot.lane.b32.xlu0 %v1469_v50, %s4966_s22 }
 0x186   : > { %1677 = vst [vmem:[#allocation2 + $0x38] sm:$0x3] %v1470_v52  ;;  %1678 = vrot.lane.b32.xlu1 %v1467_v42, %s4967_s23 }
 0x189   : > { %1515 = vrot.lane.b32.xlu0 %v1467_v42, %s4968_s24 }
 0x18a   : > { %1487 = vrot.lane.b32.xlu1 %v1468_v47, %s4966_s22 }
 0x18d   : > { %1519 = vrot.lane.b32.xlu0 %v1469_v50, %s4968_s24 }
 0x18e   : > { %1512 = vrot.lane.b32.xlu1 %v1470_v52, %s4968_s24 }
 0x191   : > { %1569 = vrot.lane.b32.xlu0 %v1467_v42, %s4969_s19 }
 0x192   : > { %1517 = vrot.lane.b32.xlu1 %v1468_v47, %s4968_s24 }
 0x195   : > { %1573 = vrot.lane.b32.xlu0 %v1469_v50, %s4969_s19 }
 0x196   : > { %1566 = vrot.lane.b32.xlu1 %v1470_v52, %s4969_s19 }
 0x199   : > { %1623 = vrot.lane.b32.xlu0 %v1467_v42, %s4971_s17 }
 0x19a   : > { %1571 = vrot.lane.b32.xlu1 %v1468_v47, %s4969_s19 }
 0x19d   : > { %1627 = vrot.lane.b32.xlu0 %v1469_v50, %s4971_s17 }
 0x19e   : > { %1620 = vrot.lane.b32.xlu1 %v1470_v52, %s4971_s17 }
 0x1a1   : > { %1479 = vrot.lane.b32.xlu0 %v1470_v52, %s4966_s22 }
 0x1a2   : > { %1625 = vrot.lane.b32.xlu1 %v1468_v47, %s4971_s17 }
 0x1a5   : > { %1680 = vrot.lane.b32.xlu0 %v1468_v47, %s4967_s23 }
 0x1a6   : > { %1682 = vrot.lane.b32.xlu1 %v1469_v50, %s4967_s23 }
 0x1a9   : > { %1684 = vrot.lane.b32.xlu0 %v1470_v52, %s4967_s23  ;;  %v1802_v52 = vrot.slane %v1794_v27, 6 }
 0x1f4   : > { %v5463_v59 = vpop.permute.xlu1 %1485 }
 0x1f7   : > { %v5465_v60 = vpop.permute.xlu0 %1489 }
 0x1f8   : > { %v5467_v2 = vpop.permute.xlu1 %1678 }
 0x1fb   : > { %v1516_v22 = vpop.permute.xlu0 %1515 }
 0x1fc   : > { %v1488_v39 = vpop.permute.xlu1 %1487 }
 0x1fd   : > { %v1492_v23 = vsel %vm1491_vm2, %v5463_v59, %v1488_v39  ;;  %v1493_v28 = vsel %vm1491_vm2, %v1488_v39, %v5465_v60 }
 0x1fe   : > { %v1505_v32 = vmul.f32 %v1501_v35, %v1492_v23  ;;  %v1506_v33 = vmul.f32 %v1502_v38, %v1493_v28  ;;  %v1736_v34 = vmul.f32 %v1728_v5, %v1492_v23  ;;  %v1737_v36 = vmul.f32 %v1729_v8, %v1493_v28  ;;  %v1792_v5 = vld [vmem:[#allocation8 + $0x20] sm:$0xc0]  ;;  %v1793_v8 = vld [vmem:[#allocation8 + $0x28] sm:$0xc0] }
 0x1ff   : > { %v1520_v45 = vpop.permute.xlu0 %1519  ;;  %v1594_v35 = vrot.slane %v1586_v48, 4  ;;  %v1800_v23 = vrot.slane %v1792_v5, 6  ;;  %v1801_v28 = vrot.slane %v1793_v8, 6 }
 0x200   : > { %1509 = vst [vmem:[#allocation2 + $0x8] sm:$0x3] %v1505_v32  ;;  %1510 = vst [vmem:[#allocation2 + $0x10] sm:$0x3] %v1506_v33  ;;  %v1744_v55 = vrot.slane %v1736_v34, 4  ;;  %v1745_v6 = vrot.slane %v1737_v36, 4  ;;  %v1513_v7 = vpop.permute.xlu1 %1512 }
 0x201   : > { %v1524_v15 = vsel %vm1521_vm3, %v1520_v45, %v1513_v7  ;;  %v1529_v16 = vsel %vm1521_vm3, %v1513_v7, %v1516_v22  ;;  %v1641_v36 = vld [vmem:[#allocation8 + $0x18] sm:$0xc0] }
 0x202   : > { %1752 = vst [vmem:[#allocation2 + $0x20] sm:$0x30] %v1744_v55  ;;  %1753 = vst [vmem:[#allocation2 + $0x28] sm:$0x30] %v1745_v6  ;;  %v1546_v18 = vmul.f32 %v1538_v53, %v1529_v16  ;;  %v1549_v19 = vmul.f32 %v1541_v0, %v1524_v15  ;;  %v1774_v20 = vmul.f32 %v1766_v30, %v1524_v15  ;;  %v1638_v30 = vld [vmem:[#allocation8] sm:$0xc0] }
 0x203   : > { %v1775_v25 = vmul.f32 %v1767_v31, %v1529_v16  ;;  %v1570_v17 = vpop.permute.xlu0 %1569  ;;  %v1649_v7 = vrot.slane %v1641_v36, 6 }
 0x204   : > { %v1554_v41 = vrot.slane %v1546_v18, 6  ;;  %v1557_v42 = vrot.slane %v1549_v19, 6  ;;  %v1782_v43 = vrot.slane %v1774_v20, 2  ;;  %v1518_v47 = vpop.permute.xlu1 %1517  ;;  %v1723_v18 = vld [vmem:[#allocation8 + $0x38] sm:$0xc] }
 0x205   : > { %v1783_v46 = vrot.slane %v1775_v25, 2  ;;  %v1522_v49 = vsel %vm1521_vm3, %v1516_v22, %v1518_v47  ;;  %v1523_v50 = vsel %vm1521_vm3, %v1518_v47, %v1520_v45  ;;  %v1639_v20 = vld [vmem:[#allocation8 + $0x8] sm:$0xc0]  ;;  %v1731_v40 = vrot.slane %v1723_v18, 2 }
 0x206   : > { %1562 = vst [vmem:[#allocation2] sm:$0xc] %v1554_v41  ;;  %1565 = vst [vmem:[#allocation2 + $0x18] sm:$0xc] %v1557_v42  ;;  %v1547_v61 = vmul.f32 %v1539_v51, %v1522_v49  ;;  %v1548_v62 = vmul.f32 %v1540_v54, %v1523_v50  ;;  %v1772_v3 = vmul.f32 %v1764_v63, %v1522_v49  ;;  %v1646_v54 = vrot.slane %v1638_v30, 6 }
 0x207   : > { %1790 = vst [vmem:[#allocation2 + $0x30] sm:$0xc0] %v1782_v43  ;;  %1791 = vst [vmem:[#allocation2 + $0x38] sm:$0xc0] %v1783_v46  ;;  %v1773_v4 = vmul.f32 %v1765_v21, %v1523_v50  ;;  %v1574_v10 = vpop.permute.xlu0 %1573  ;;  %v1722_v21 = vld [vmem:[#allocation8 + $0x30] sm:$0xc] }
 0x208   : > { %v1555_v38 = vrot.slane %v1547_v61, 6  ;;  %v1556_v39 = vrot.slane %v1548_v62, 6  ;;  %v1780_v22 = vrot.slane %v1772_v3, 2  ;;  %v1567_v0 = vpop.permute.xlu1 %1566  ;;  %v1500_v43 = vld [vmem:[#allocation8] sm:$0x3]  ;;  %v1647_v50 = vrot.slane %v1639_v20, 6 }
 0x209   : > { %v1781_v53 = vrot.slane %v1773_v4, 2  ;;  %v1578_v1 = vsel %vm1575_vm4, %v1574_v10, %v1567_v0  ;;  %v1583_v13 = vsel %vm1575_vm4, %v1567_v0, %v1570_v17  ;;  %v1503_v46 = vld [vmem:[#allocation8 + $0x18] sm:$0x3] }
 0x20a   : > { %1563 = vst [vmem:[#allocation2 + $0x8] sm:$0xc] %v1555_v38  ;;  %1564 = vst [vmem:[#allocation2 + $0x10] sm:$0xc] %v1556_v39  ;;  %v1600_v31 = vmul.f32 %v1592_v24, %v1583_v13  ;;  %v1603_v32 = vmul.f32 %v1595_v26, %v1578_v1  ;;  %v1810_v33 = vmul.f32 %v1802_v52, %v1578_v1  ;;  %v1831_v24 = vsel %vm1829_vm6, %v1816_v12, 0 }
 0x20b   : > { %1788 = vst [vmem:[#allocation2 + $0x20] sm:$0xc0] %v1780_v22  ;;  %1789 = vst [vmem:[#allocation2 + $0x28] sm:$0xc0] %v1781_v53  ;;  %v1811_v34 = vmul.f32 %v1803_v58, %v1583_v13  ;;  %v1624_v37 = vpop.permute.xlu0 %1623  ;;  %v1730_v26 = vrot.slane %v1722_v21, 2  ;;  %v5487_v58 = vand.u32 4294901760, %v1831_v24 }
 0x20c   : > { %v1608_v44 = vrot.slane %v1600_v31, 4  ;;  %v1611_v45 = vrot.slane %v1603_v32, 4  ;;  %1814 = vst [vmem:[#allocation2 + $0x50] sm:$0x3] %v1810_v33  ;;  %v1572_v51 = vpop.permute.xlu1 %1571  ;;  %v1696_v38 = vld [vmem:[#allocation8 + $0x20] sm:$0x3] }
 0x20d   : > { %1815 = vst [vmem:[#allocation2 + $0x58] sm:$0x3] %v1811_v34  ;;  %v1576_v55 = vsel %vm1575_vm4, %v1570_v17, %v1572_v51  ;;  %v1577_v6 = vsel %vm1575_vm4, %v1572_v51, %v1574_v10  ;;  %v1640_v17 = vld [vmem:[#allocation8 + $0x10] sm:$0xc0]  ;;  %v1697_v13 = vld [vmem:[#allocation8 + $0x28] sm:$0x3]  ;;  %v5498_v31 = vsub.f32 %v1831_v24, %v5487_v58 }
 0x20e   : > { %1616 = vst [vmem:[#allocation2] sm:$0x30] %v1608_v44  ;;  %1619 = vst [vmem:[#allocation2 + $0x18] sm:$0x30] %v1611_v45  ;;  %v1601_v14 = vmul.f32 %v1593_v11, %v1576_v55  ;;  %v1602_v15 = vmul.f32 %v1594_v35, %v1577_v6  ;;  %v1808_v16 = vmul.f32 %v1800_v23, %v1576_v55  ;;  %v1648_v52 = vrot.slane %v1640_v17, 6 }
 0x20f   : > { %v1809_v63 = vmul.f32 %v1801_v28, %v1577_v6  ;;  %v1628_v19 = vpop.permute.xlu0 %1627  ;;  %v1698_v44 = vld [vmem:[#allocation8 + $0x30] sm:$0x3]  ;;  %v5506_v18 = vand.u32 4294901760, %v5498_v31 }
 0x210   : > { %v1609_v25 = vrot.slane %v1601_v14, 4  ;;  %v1610_v27 = vrot.slane %v1602_v15, 4  ;;  %1812 = vst [vmem:[#allocation2 + $0x40] sm:$0x3] %v1808_v16  ;;  %v1621_v29 = vpop.permute.xlu1 %1620 }
 0x211   : > { %1813 = vst [vmem:[#allocation2 + $0x48] sm:$0x3] %v1809_v63  ;;  %v1632_v41 = vsel %vm1629_vm5, %v1628_v19, %v1621_v29  ;;  %v1637_v42 = vsel %vm1629_vm5, %v1621_v29, %v1624_v37 }
 0x212   : > { %1617 = vst [vmem:[#allocation2 + $0x8] sm:$0x30] %v1609_v25  ;;  %1618 = vst [vmem:[#allocation2 + $0x10] sm:$0x30] %v1610_v27  ;;  %v1654_v47 = vmul.f32 %v1646_v54, %v1637_v42  ;;  %v1657_v48 = vmul.f32 %v1649_v7, %v1632_v41  ;;  %v1920_v41 = vsub.f32 %v5498_v31, %v5506_v18 }
 0x213   : > { %v1480_v49 = vpop.permute.xlu0 %1479  ;;  %v1827_v21 = vld [vmem:[#allocation2 + $0x50] sm:$0x7] }
 0x214   : > { %v1494_v61 = vsel %vm1491_vm2, %v5465_v60, %v1480_v49  ;;  %v1499_v62 = vsel %vm1491_vm2, %v1480_v49, %v5463_v59  ;;  %v1662_v3 = vrot.slane %v1654_v47, 2  ;;  %v1665_v4 = vrot.slane %v1657_v48, 2  ;;  %v1626_v5 = vpop.permute.xlu1 %1625  ;;  %v1828_v30 = vld [vmem:[#allocation2 + $0x58] sm:$0x7] }
 0x215   : > { %v1504_v8 = vmul.f32 %v1500_v43, %v1499_v62  ;;  %v1507_v10 = vmul.f32 %v1503_v46, %v1494_v61  ;;  %v1738_v11 = vmul.f32 %v1730_v26, %v1494_v61  ;;  %v1739_v35 = vmul.f32 %v1731_v40, %v1499_v62 }
 0x216   : > { %1670 = vst [vmem:[#allocation2] sm:$0xc0] %v1662_v3  ;;  %1673 = vst [vmem:[#allocation2 + $0x18] sm:$0xc0] %v1665_v4  ;;  %v1630_v39 = vsel %vm1629_vm5, %v1624_v37, %v1626_v5  ;;  %v1631_v22 = vsel %vm1629_vm5, %v1626_v5, %v1628_v19  ;;  %v1699_v37 = vld [vmem:[#allocation8 + $0x38] sm:$0x3] }
 0x217   : > { %1508 = vst [vmem:[#allocation2] sm:$0x3] %v1504_v8  ;;  %1511 = vst [vmem:[#allocation2 + $0x18] sm:$0x3] %v1507_v10  ;;  %v1746_v60 = vrot.slane %v1738_v11, 4  ;;  %v1747_v53 = vrot.slane %v1739_v35, 4  ;;  %v1681_v0 = vpop.permute.xlu0 %1680  ;;  %v1655_v59 = vmul.f32 %v1647_v50, %v1630_v39  ;;  %v1656_v1 = vmul.f32 %v1648_v52, %v1631_v22 }
 0x218   : > { %v1687_v23 = vsel %vm1686_vm7, %v5467_v2, %v1681_v0  ;;  %v1683_v28 = vpop.permute.xlu1 %1682  ;;  %v1826_v55 = vld [vmem:[#allocation2 + $0x48] sm:$0x7]  ;;  %v1844_v6 = vsel %vm1833_vm8, %v1828_v30, 0  ;;  %v1825_v15 = vld [vmem:[#allocation2 + $0x40] sm:$0x7]  ;;  %v1841_v40 = vsel %vm1833_vm8, %v1827_v21, 0 }
 0x219   : > { %1754 = vst [vmem:[#allocation2 + $0x30] sm:$0x30] %v1746_v60  ;;  %1755 = vst [vmem:[#allocation2 + $0x38] sm:$0x30] %v1747_v53  ;;  %v1700_v32 = vmul.f32 %v1696_v38, %v1687_v23  ;;  %v1663_v33 = vrot.slane %v1655_v59, 2  ;;  %v1664_v34 = vrot.slane %v1656_v1, 2  ;;  %v1688_v36 = vsel %vm1686_vm7, %v1681_v0, %v1683_v28 }
 0x21a   : > { %v1701_v45 = vmul.f32 %v1697_v13, %v1688_v36  ;;  %v1838_v25 = vsel %vm1833_vm8, %v1826_v55, 0  ;;  %v5509_v27 = vand.u32 4294901760, %v1844_v6  ;;  %v1835_v24 = vsel %vm1833_vm8, %v1825_v15, 0 }
 0x21b   : > { %v1708_v51 = vrot.slane %v1700_v32, 6  ;;  %1671 = vst [vmem:[#allocation2 + $0x8] sm:$0xc0] %v1663_v33  ;;  %1672 = vst [vmem:[#allocation2 + $0x10] sm:$0xc0] %v1664_v34  ;;  %v1685_v54 = vpop.permute.xlu0 %1684  ;;  %v5517_v47 = vand.u32 4294901760, %v1838_v25 }
 0x21c   : > { %v1695_v7 = vsel %vm1686_vm7, %v1685_v54, %v5467_v2  ;;  %v1689_v12 = vsel %vm1686_vm7, %v1683_v28, %v1685_v54  ;;  %v1709_v14 = vrot.slane %v1701_v45, 6  ;;  %v5519_v48 = vand.u32 4294901760, %v1835_v24 }
 0x21d   : > { %1716 = vst [vmem:[#allocation2 + $0x20] sm:$0xc] %v1708_v51  ;;  %v1703_v16 = vmul.f32 %v1699_v37, %v1695_v7  ;;  %v1702_v63 = vmul.f32 %v1698_v44, %v1689_v12  ;;  %v5521_v52 = vand.u32 4294901760, %v1841_v40  ;;  %v5524_v61 = vsub.f32 %v1844_v6, %v5509_v27 }
 0x21e   : > { %1717 = vst [vmem:[#allocation2 + $0x28] sm:$0xc] %v1709_v14  ;;  %v1820_v19 = vld [vmem:[#allocation2 + $0x18] sm:$0xff]  ;;  %v1817_v20 = vld [vmem:[#allocation2] sm:$0xff]  ;;  %v1921_v11 = vand.u32 4294901760, %v1920_v41  ;;  %v5533_v38 = vsub.f32 %v1835_v24, %v5519_v48  ;;  %v5537_v22 = vsub.f32 %v1838_v25, %v5517_v47 }
 0x21f   : > { %v1711_v29 = vrot.slane %v1703_v16, 6  ;;  %v1710_v2 = vrot.slane %v1702_v63, 6  ;;  %v1848_v17 = vand.u32 4294901760, %v1817_v20  ;;  %v2363_v26 = vand.u32 4294901760, %v1820_v19 }
 0x220   : > { %v5542_v53 = vsub.f32 %v1841_v40, %v5521_v52  ;;  %v2471_v59 = vand.u32 4294901760, %v5524_v61  ;;  %v1954_v54 = vand.u32 4294901760, %v5537_v22  ;;  %v1960_v63 = vand.u32 4294901760, %v5533_v38 }
 0x221   : > { %1719 = vst [vmem:[#allocation2 + $0x38] sm:$0xc] %v1711_v29  ;;  %1718 = vst [vmem:[#allocation2 + $0x30] sm:$0xc] %v1710_v2  ;;  %v5515_v43 = vsub.f32 %v1817_v20, %v1848_v17  ;;  %v5526_v62 = vsub.f32 %v1820_v19, %v2363_v26 }
 0x222   : > { %v1818_v42 = vld [vmem:[#allocation2 + $0x8] sm:$0xff]  ;;  %v1819_v46 = vld [vmem:[#allocation2 + $0x10] sm:$0xff]  ;;  %v2472_v41 = vsub.f32 %v5524_v61, %v2471_v59 }
 0x223   : > { %v1846_v49 = vand.u32 4294901760, %v1818_v42  ;;  %v2365_v50 = vand.u32 4294901760, %v1819_v46  ;;  %v1936_v39 = vand.u32 4294901760, %v5515_v43  ;;  %v2447_v32 = vand.u32 4294901760, %v5526_v62 }
 0x224   : > { %v1821_v3 = vld [vmem:[#allocation2 + $0x20] sm:$0xff] }
 0x225   : > { %v1822_v4 = vld [vmem:[#allocation2 + $0x28] sm:$0xff]  ;;  %v5528_v5 = vsub.f32 %v1818_v42, %v1846_v49  ;;  %v1852_v8 = vand.u32 4294901760, %v1821_v3  ;;  %v5530_v10 = vsub.f32 %v1819_v46, %v2365_v50  ;;  %v1937_v51 = vsub.f32 %v5515_v43, %v1936_v39 }
 0x226   : > { %v1850_v35 = vand.u32 4294901760, %v1822_v4  ;;  %v2448_v15 = vsub.f32 %v5526_v62, %v2447_v32 }
 0x227   : > { %v5539_v60 = vsub.f32 %v1821_v3, %v1852_v8  ;;  %v1930_v0 = vand.u32 4294901760, %v5528_v5  ;;  %v5550_v28 = vpack.c.bf16 %v1852_v8, %v1848_v17  ;;  %v2453_v37 = vand.u32 4294901760, %v5530_v10 }
 0x228   : > { %v5546_v1 = vpack.c.bf16 %v1850_v35, %v1846_v49  ;;  %v5548_v13 = vsub.f32 %v1822_v4, %v1850_v35  ;;  %v1824_v23 = vld [vmem:[#allocation2 + $0x38] sm:$0xff]  ;;  %v1823_v30 = vld [vmem:[#allocation2 + $0x30] sm:$0xff]  ;;  %v1955_v17 = vsub.f32 %v5537_v22, %v1954_v54  ;;  %v2449_v46 = vand.u32 4294901760, %v2448_v15 }
 0x229   : > { %v2367_v33 = vand.u32 4294901760, %v1824_v23  ;;  %v2369_v34 = vand.u32 4294901760, %v1823_v30  ;;  %v1948_v36 = vand.u32 4294901760, %v5539_v60  ;;  %v1931_v44 = vsub.f32 %v5528_v5, %v1930_v0 }
 0x22a   : > { %4572 = vmatprep.subr.bf16.mxu0 %v5546_v1  ;;  %v1942_v45 = vand.u32 4294901760, %v5548_v13  ;;  %v2454_v19 = vsub.f32 %v5530_v10, %v2453_v37  ;;  %v1961_v49 = vsub.f32 %v5533_v38, %v1960_v63 }
 0x22b   : > { %v5564_v55 = vpack.c.bf16 %v2367_v33, %v2363_v26  ;;  %v5566_v6 = vsub.f32 %v1824_v23, %v2367_v33  ;;  %4574 = vmatpush1.bf16.msra.mxu0 %v5550_v28  ;;  %v5569_v7 = vpack.c.bf16 %v2369_v34, %v2365_v50  ;;  %v5571_v12 = vsub.f32 %v1823_v30, %v2369_v34 }
 0x22c   : > { %1855 = vmatprep.subr.mxu0 %v5517_v47  ;;  %v1943_v14 = vsub.f32 %v5548_v13, %v1942_v45  ;;  %v1949_v16 = vsub.f32 %v5539_v60, %v1948_v36  ;;  %v1932_v25 = vand.u32 4294901760, %v1931_v44  ;;  %v1938_v26 = vand.u32 4294901760, %v1937_v51 }
 0x22d   : > { %4596 = vmatprep.subr.bf16.mxu1 %v5564_v55  ;;  %v2459_v21 = vand.u32 4294901760, %v5566_v6  ;;  %v2465_v20 = vand.u32 4294901760, %v5571_v12  ;;  %v2477_v50 = vand.u32 4294901760, %v5542_v53  ;;  %v2455_v8 = vand.u32 4294901760, %v2454_v19 }
 0x22e   : > { %4598 = vmatpush1.bf16.msra.mxu1 %v5569_v7  ;;  %v1944_v29 = vand.u32 4294901760, %v1943_v14  ;;  %v1950_v2 = vand.u32 4294901760, %v1949_v16  ;;  %v1956_v23 = vand.u32 4294901760, %v1955_v17  ;;  %v2473_v44 = vand.u32 4294901760, %v2472_v41  ;;  %v2907_v17 = vld [vmem:[#allocation8 + $0x10] sm:$0x3] }
 0x22f   : > { %2372 = vmatprep.subr.mxu1 %v5509_v27  ;;  %1857 = vmatpush1.msra.mxu0 %v5519_v48  ;;  %v2460_v24 = vsub.f32 %v5566_v6, %v2459_v21  ;;  %v2466_v40 = vsub.f32 %v5571_v12, %v2465_v20  ;;  %v2478_v34 = vsub.f32 %v5542_v53, %v2477_v50  ;;  %v1962_v51 = vand.u32 4294901760, %v1961_v49  ;;  %v2935_v49 = vld [vmem:[#allocation8 + $0x8] sm:$0xc] }
 0x230   : > { %1922 = vmatmul.mubr.f32.vlgmr.msra.gmra.mrb[2].mxu0 %v1921_v11  ;;  %v4575_v42 = vpack.c.bf16 %v1944_v29, %v1932_v25  ;;  %v4577_v4 = vpack.c.bf16 %v1950_v2, %v1938_v26  ;;  %v4579_v14 = vpack.c.bf16 %v5548_v13, %v5528_v5  ;;  %v4603_v16 = vpack.c.bf16 %v5566_v6, %v5526_v62  ;;  %v2906_v2 = vld [vmem:[#allocation8 + $0x8] sm:$0x3] }
 0x231   : > { %v2461_v3 = vand.u32 4294901760, %v2460_v24  ;;  %v2467_v35 = vand.u32 4294901760, %v2466_v40  ;;  %2022 = vmatprep.mubr.f32.mxu0 %v4964_v9  ;;  %v2479_v15 = vand.u32 4294901760, %v2478_v34  ;;  %v4605_v19 = vpack.c.bf16 %v5571_v12, %v5530_v10  ;;  %v3123_v10 = vld [vmem:[#allocation8 + $0x30] sm:$0xc] }
 0x232   : > { %2374 = vmatpush1.msra.mxu1 %v5521_v52  ;;  %4576 = vmatprep.subr.bf16.mxu0 %v4575_v42  ;;  %v4587_v25 = vpack.c.bf16 %v1942_v45, %v1930_v0  ;;  %v4611_v29 = vpack.c.bf16 %v2459_v21, %v2447_v32  ;;  %v4613_v5 = vpack.c.bf16 %v2465_v20, %v2453_v37  ;;  %v3122_v0 = vld [vmem:[#allocation8 + $0x28] sm:$0xc]  ;;  %v2934_v32 = vld [vmem:[#allocation8] sm:$0xc]  ;;  %v3159_v21 = vld [vmem:[#allocation8 + $0x30] sm:$0x30] }
 0x233   : > { %2439 = vmatmul.mubr.f32.vlgmr.msra.gmra.mrb[2].mxu1 %v1921_v11  ;;  %v4599_v30 = vpack.c.bf16 %v2461_v3, %v2449_v46  ;;  %4578 = vmatpush1.bf16.msra.mxu0 %v4577_v4  ;;  %v4601_v33 = vpack.c.bf16 %v2467_v35, %v2455_v8  ;;  %v4581_v11 = vpack.c.bf16 %v5539_v60, %v5515_v43  ;;  %v3131_v60 = vrot.slane %v3123_v10, 2  ;;  %v3160_v20 = vld [vmem:[#allocation8 + $0x38] sm:$0x30] }
 0x234   : > { %1957 = vmatprep.subr.mxu0 %v1956_v23  ;;  %2539 = vmatprep.mubr.f32.mxu1 %v4964_v9  ;;  %v2942_v24 = vrot.slane %v2934_v32, 2  ;;  %v3167_v8 = vrot.slane %v3159_v21, 4  ;;  %v3168_v35 = vrot.slane %v3160_v20, 4 }
 0x235   : > { %4600 = vmatprep.subr.bf16.mxu1 %v4599_v30 }
 0x236   : > { %4602 = vmatpush1.bf16.msra.mxu1 %v4601_v33 }
 0x237   : > { %2474 = vmatprep.subr.mxu1 %v2473_v44  ;;  %1963 = vmatpush1.msra.mxu0 %v1962_v51  ;;  %v3157_v44 = vld [vmem:[#allocation8 + $0x20] sm:$0x30]  ;;  %v3158_v51 = vld [vmem:[#allocation8 + $0x28] sm:$0x30] }
 0x238   : > { %2024 = vmatmul.mubr.f32.vlgmr.msra.gmra.mrb[2].mxu0 %v5487_v58  ;;  %4580 = vmatprep.subr.bf16.mxu0 %v4579_v14  ;;  %v2943_v14 = vrot.slane %v2935_v49, 2 }
 0x239   : > { %4582 = vmatpush1.bf16.msra.mxu0 %v4581_v11  ;;  %2106 = vmatprep.mubr.f32.mxu0 %v4964_v9 }
 0x23a   : > { %2480 = vmatpush1.msra.mxu1 %v2479_v15  ;;  %2044 = vmatprep.subr.mxu0 %v5537_v22 }
 0x23b   : > { %2541 = vmatmul.mubr.f32.vlgmr.msra.gmra.mrb[2].mxu1 %v5487_v58  ;;  %4604 = vmatprep.subr.bf16.mxu1 %v4603_v16 }
 0x23c   : > { %4606 = vmatpush1.bf16.msra.mxu1 %v4605_v19  ;;  %2623 = vmatprep.mubr.f32.mxu1 %v4964_v9 }
 0x23d   : > { %2561 = vmatprep.subr.mxu1 %v5524_v61  ;;  %2047 = vmatpush1.msra.mxu0 %v5533_v38 }
 0x23e   : > { %4584 = vmatprep.subr.bf16.mxu0 %v5546_v1 }
 0x240   : > { %2564 = vmatpush1.msra.mxu1 %v5542_v53  ;;  %2109 = vmatmul.mubr.f32.vlgmr.msra.gmra.mrb[2].mxu0 %v5498_v31  ;;  %v3121_v53 = vld [vmem:[#allocation8 + $0x20] sm:$0xc] }
 0x241   : > { %4608 = vmatprep.subr.bf16.mxu1 %v5564_v55  ;;  %4586 = vmatpush1.bf16.msra.mxu0 %v5550_v28 }
 0x242   : > { %2124 = vmatprep.subr.mxu0 %v5517_v47  ;;  %2185 = vmatprep.mubr.f32.mxu0 %v4964_v9 }
 0x243   : > { %2626 = vmatmul.mubr.f32.vlgmr.msra.gmra.mrb[2].mxu1 %v5498_v31  ;;  %v4589_v31 = vpack.c.bf16 %v1948_v36, %v1936_v39  ;;  %v2937_v36 = vld [vmem:[#allocation8 + $0x18] sm:$0xc] }
 0x244   : > { %4610 = vmatpush1.bf16.msra.mxu1 %v5569_v7  ;;  %2702 = vmatprep.mubr.f32.mxu1 %v4964_v9  ;;  %v2945_v26 = vrot.slane %v2937_v36, 2 }
 0x245   : > { %2641 = vmatprep.subr.mxu1 %v5509_v27  ;;  %2126 = vmatpush1.msra.mxu0 %v5519_v48 }
 0x246   : > { %4588 = vmatprep.subr.bf16.mxu0 %v4587_v25 }
 0x248   : > { %2643 = vmatpush1.msra.mxu1 %v5521_v52  ;;  %2189 = vmatmul.mubr.f32.vlgmr.msra.gmra.mrb[2].mxu0 %v5506_v18 }
 0x249   : > { %4612 = vmatprep.subr.bf16.mxu1 %v4611_v29  ;;  %4590 = vmatpush1.bf16.msra.mxu0 %v4589_v31  ;;  %v2987_v29 = vld [vmem:[#allocation8] sm:$0x30]  ;;  %v2990_v31 = vld [vmem:[#allocation8 + $0x18] sm:$0x30] }
 0x24a   : > { %2214 = vmatprep.subr.mxu0 %v1954_v54  ;;  %2277 = vmatprep.mubr.f32.mxu0 %v4964_v9  ;;  %v3129_v54 = vrot.slane %v3121_v53, 2  ;;  %v2995_v10 = vrot.slane %v2987_v29, 4 }
 0x24b   : > { %2706 = vmatmul.mubr.f32.vlgmr.msra.gmra.mrb[2].mxu1 %v5506_v18 }
 0x24c   : > { %4614 = vmatpush1.bf16.msra.mxu1 %v4613_v5  ;;  %2794 = vmatprep.mubr.f32.mxu1 %v4964_v9 }
 0x24d   : > { %2731 = vmatprep.subr.mxu1 %v2471_v59  ;;  %2218 = vmatpush1.msra.mxu0 %v1960_v63  ;;  %v2905_v59 = vld [vmem:[#allocation8] sm:$0x3] }
 0x24e   : > { %4592 = vmatprep.subr.bf16.mxu0 %v5546_v1  ;;  %v2908_v1 = vld [vmem:[#allocation8 + $0x18] sm:$0x3] }
 0x250   : > { %2735 = vmatpush1.msra.mxu1 %v2477_v50  ;;  %2279 = vmatmul.mubr.f32.vlgmr.msra.gmra.mrb[2].mxu0 %v5487_v58  ;;  %v2936_v50 = vld [vmem:[#allocation8 + $0x10] sm:$0xc] }
 0x251   : > { %4616 = vmatprep.subr.bf16.mxu1 %v5564_v55  ;;  %4594 = vmatpush1.bf16.msra.mxu0 %v5550_v28  ;;  %v3130_v55 = vrot.slane %v3122_v0, 2  ;;  %v2944_v11 = vrot.slane %v2936_v50, 2 }
 0x252   : > { %2294 = vmatprep.subr.mxu0 %v5517_v47  ;;  %2355 = vmatprep.mubr.f32.mxu0 %v4964_v9 }
 0x253   : > { %2796 = vmatmul.mubr.f32.vlgmr.msra.gmra.mrb[2].mxu1 %v5487_v58 }
 0x254   : > { %4618 = vmatpush1.bf16.msra.mxu1 %v5569_v7  ;;  %2872 = vmatprep.mubr.f32.mxu1 %v4964_v9 }
 0x255   : > { %2811 = vmatprep.subr.mxu1 %v5509_v27  ;;  %2296 = vmatpush1.msra.mxu0 %v5519_v48 }
 0x258   : > { %2813 = vmatpush1.msra.mxu1 %v5521_v52  ;;  %2357 = vmatmul.mubr.f32.vlgmr.msra.gmra.mrb[2].mxu0 %v5487_v58 }
 0x259   : > { %3315 = vmatprep.mubr.f32.mxu0 %v4964_v9 }
 0x25b   : > { %2874 = vmatmul.mubr.f32.vlgmr.msra.gmra.mrb[2].mxu1 %v5487_v58  ;;  %v3124_v58 = vld [vmem:[#allocation8 + $0x38] sm:$0xc] }
 0x25c   : > { %3832 = vmatprep.mubr.f32.mxu1 %v4964_v9  ;;  %v3132_v22 = vrot.slane %v3124_v58, 2  ;;  %v3196_v58 = vld [vmem:[#allocation8 + $0x38] sm:$0xc0] }
 0x32b   : > { %v2358_v18 = vpop.f32.mrb[2].mxu0 }
 0x32c   : > { %v2880_v43 = vmax.f32 %v2358_v18, 0.0  ;;  %v2360_v47 = vpop.f32.mrb[3].mxu0 }
 0x32d   : > { %v2881_v61 = vmax.f32 %v2360_v47, 0.0  ;;  %v3166_v47 = vrot.slane %v3158_v51, 4 }
 0x32e   : > { %3076 = vst [vmem:[#allocation2 + $0x20] sm:$0x3] %v2880_v43  ;;  %v2875_v62 = vpop.f32.mrb[2].mxu1  ;;  %3080 = vrot.lane.b32.xlu1 %v2880_v43, %s4967_s23  ;;  %2891 = vrot.lane.b32.xlu0 %v2880_v43, %s4966_s22 }
 0x32f   : > { %v2882_v27 = vmax.f32 %v2875_v62, 0.0  ;;  %3077 = vst [vmem:[#allocation2 + $0x28] sm:$0x3] %v2881_v61  ;;  %v2877_v48 = vpop.f32.mrb[3].mxu1 }
 0x330   : > { %v2883_v52 = vmax.f32 %v2877_v48, 0.0 }
 0x331   : > { %3078 = vst [vmem:[#allocation2 + $0x30] sm:$0x3] %v2882_v27 }
 0x332   : > { %3079 = vst [vmem:[#allocation2 + $0x38] sm:$0x3] %v2883_v52  ;;  %2885 = vrot.lane.b32.xlu1 %v2883_v52, %s4966_s22  ;;  %2895 = vrot.lane.b32.xlu0 %v2882_v27, %s4966_s22 }
 0x336   : > { %2920 = vrot.lane.b32.xlu0 %v2880_v43, %s4968_s24  ;;  %2893 = vrot.lane.b32.xlu1 %v2881_v61, %s4966_s22  ;;  %s4474_s22 = sshll.u32 %s5043_s7, 6  ;;  %s4973_s7 = smov [#allocation11]  }
 0x337   : > { %s5927_s11 = scalar_lea.hbm %s5981_s8, %s4474_s22  ;;  %s4887_s27 = sshll.u32 %s4973_s7, 4  ;;  %s4888_s27 = int_to_ptr.vmem [resolvable:$false] %s4887_s27 }
 0x33a   : > { %2924 = vrot.lane.b32.xlu0 %v2882_v27, %s4968_s24  ;;  %2917 = vrot.lane.b32.xlu1 %v2883_v52, %s4968_s24 }
 0x33e   : > { %2973 = vrot.lane.b32.xlu0 %v2880_v43, %s4969_s19  ;;  %2922 = vrot.lane.b32.xlu1 %v2881_v61, %s4968_s24 }
 0x342   : > { %2977 = vrot.lane.b32.xlu0 %v2882_v27, %s4969_s19  ;;  %2970 = vrot.lane.b32.xlu1 %v2883_v52, %s4969_s19 }
 0x346   : > { %3026 = vrot.lane.b32.xlu0 %v2880_v43, %s4971_s17  ;;  %2975 = vrot.lane.b32.xlu1 %v2881_v61, %s4969_s19  ;;  %v3165_v43 = vrot.slane %v3157_v44, 4 }
 0x34a   : > { %3030 = vrot.lane.b32.xlu0 %v2882_v27, %s4971_s17  ;;  %3023 = vrot.lane.b32.xlu1 %v2883_v52, %s4971_s17 }
 0x34e   : > { %3082 = vrot.lane.b32.xlu0 %v2881_v61, %s4967_s23  ;;  %3028 = vrot.lane.b32.xlu1 %v2881_v61, %s4971_s17 }
 0x352   : > { %3086 = vrot.lane.b32.xlu0 %v2883_v52, %s4967_s23  ;;  %3084 = vrot.lane.b32.xlu1 %v2882_v27, %s4967_s23  ;;  %v3195_v52 = vld [vmem:[#allocation8 + $0x30] sm:$0xc0]  ;;  %s353_s23 = scalar_lea.vmem [#allocation11], %s4466_s18 }
 0x353   : > { %s4362_s24 = sshll.u32 %s353_s23, 4  ;;  %s5929_s24 = int_to_ptr.vmem [resolvable:$true] %s4362_s24 }
 0x354   : > { %s4883_s26 = scalar_lea.vmem %s5929_s24, 64  ;;  %p4890_p4 = scmp.lt.s32.totalorder %s5929_s24, %s4888_s27 }
 0x355   : > { %p4884_p9 = scmp.ne.s32.totalorder %s5929_s24, %s4883_s26 }
 0x357   : > { %p4885_p10 = pnand %p4884_p9, %p5126_p7 }
 0x359   : > { %p4886_p1 = pneg %p4885_p10 }
 0x3a0   : > { %v5707_v38 = vpop.permute.xlu1 %3080  ;;  %v2892_v39 = vpop.permute.xlu0 %2891 }
 0x3a4   : > { %v2886_v13 = vpop.permute.xlu1 %2885  ;;  %v2896_v28 = vpop.permute.xlu0 %2895 }
 0x3a5   : > { %v2904_v37 = vsel %vm1491_vm2, %v2886_v13, %v2892_v39  ;;  %v2899_v45 = vsel %vm1491_vm2, %v2896_v28, %v2886_v13 }
 0x3a6   : > { %v2909_v6 = vmul.f32 %v2905_v59, %v2904_v37  ;;  %v3140_v7 = vmul.f32 %v3132_v22, %v2904_v37  ;;  %v2912_v12 = vmul.f32 %v2908_v1, %v2899_v45  ;;  %v3139_v63 = vmul.f32 %v3131_v60, %v2899_v45  ;;  %v2988_v22 = vld [vmem:[#allocation8 + $0x8] sm:$0x30] }
 0x3a7   : > { %v3203_v37 = vrot.slane %v3195_v52, 6  ;;  %v3204_v45 = vrot.slane %v3196_v58, 6  ;;  %v2996_v21 = vrot.slane %v2988_v22, 4  ;;  %v3217_v52 = vld [vmem:[%s5978_s5] sm:$0x3] }
 0x3a8   : > { %2913 = vst [vmem:[#allocation2] sm:$0x3] %v2909_v6  ;;  %v3148_v40 = vrot.slane %v3140_v7, 4  ;;  %2916 = vst [vmem:[#allocation2 + $0x18] sm:$0x3] %v2912_v12  ;;  %v3147_v41 = vrot.slane %v3139_v63, 4  ;;  %v2921_v42 = vpop.permute.xlu0 %2920  ;;  %v2894_v46 = vpop.permute.xlu1 %2893 }
 0x3a9   : > { %v2897_v3 = vsel %vm1491_vm2, %v2892_v39, %v2894_v46  ;;  %v2898_v4 = vsel %vm1491_vm2, %v2894_v46, %v2896_v28  ;;  %v2998_v39 = vrot.slane %v2990_v31, 4  ;;  %v2989_v28 = vld [vmem:[#allocation8 + $0x10] sm:$0x30]  ;;  %v3193_v12 = vld [vmem:[#allocation8 + $0x20] sm:$0xc0] }
 0x3aa   : > { %3156 = vst [vmem:[#allocation2 + $0x38] sm:$0x30] %v3148_v40  ;;  %3155 = vst [vmem:[#allocation2 + $0x30] sm:$0x30] %v3147_v41  ;;  %v2910_v23 = vmul.f32 %v2906_v2, %v2897_v3  ;;  %v2911_v30 = vmul.f32 %v2907_v17, %v2898_v4  ;;  %v3137_v33 = vmul.f32 %v3129_v54, %v2897_v3  ;;  %v3194_v63 = vld [vmem:[#allocation8 + $0x28] sm:$0xc0] }
 0x3ab   : > { %v3138_v34 = vmul.f32 %v3130_v55, %v2898_v4  ;;  %v2997_v20 = vrot.slane %v2989_v28, 4  ;;  %v3201_v49 = vrot.slane %v3193_v12, 6  ;;  %v3202_v50 = vrot.slane %v3194_v63, 6 }
 0x3ac   : > { %2914 = vst [vmem:[#allocation2 + $0x8] sm:$0x3] %v2910_v23  ;;  %2915 = vst [vmem:[#allocation2 + $0x10] sm:$0x3] %v2911_v30  ;;  %v3145_v15 = vrot.slane %v3137_v33, 4  ;;  %v2925_v19 = vpop.permute.xlu0 %2924  ;;  %v2918_v25 = vpop.permute.xlu1 %2917 }
 0x3ad   : > { %v3146_v16 = vrot.slane %v3138_v34, 4  ;;  %v2928_v5 = vsel %vm1521_vm3, %v2925_v19, %v2918_v25  ;;  %v2933_v18 = vsel %vm1521_vm3, %v2918_v25, %v2921_v42  ;;  %v3040_v23 = vld [vmem:[#allocation8] sm:$0xc0]  ;;  %v3043_v30 = vld [vmem:[#allocation8 + $0x18] sm:$0xc0] }
 0x3ae   : > { %3153 = vst [vmem:[#allocation2 + $0x20] sm:$0x30] %v3145_v15  ;;  %v2950_v61 = vmul.f32 %v2942_v24, %v2933_v18  ;;  %v2953_v62 = vmul.f32 %v2945_v26, %v2928_v5  ;;  %v3175_v27 = vmul.f32 %v3167_v8, %v2928_v5  ;;  %v3176_v48 = vmul.f32 %v3168_v35, %v2933_v18  ;;  %v3041_v5 = vld [vmem:[#allocation8 + $0x8] sm:$0xc0]  ;;  %v3042_v18 = vld [vmem:[#allocation8 + $0x10] sm:$0xc0] }
 0x3af   : > { %3154 = vst [vmem:[#allocation2 + $0x28] sm:$0x30] %v3146_v16  ;;  %v3048_v15 = vrot.slane %v3040_v23, 6  ;;  %v3051_v16 = vrot.slane %v3043_v30, 6  ;;  %v3050_v22 = vrot.slane %v3042_v18, 6 }
 0x3b0   : > { %v2958_v60 = vrot.slane %v2950_v61, 6  ;;  %v2961_v53 = vrot.slane %v2953_v62, 6  ;;  %v3183_v0 = vrot.slane %v3175_v27, 2  ;;  %v3184_v59 = vrot.slane %v3176_v48, 2  ;;  %v2974_v1 = vpop.permute.xlu0 %2973  ;;  %v2923_v13 = vpop.permute.xlu1 %2922 }
 0x3b1   : > { %v2926_v32 = vsel %vm1521_vm3, %v2921_v42, %v2923_v13  ;;  %v2927_v36 = vsel %vm1521_vm3, %v2923_v13, %v2925_v19  ;;  %v3231_v13 = vsel %vm1829_vm6, %v3217_v52, 0 }
 0x3b2   : > { %2966 = vst [vmem:[#allocation2] sm:$0xc] %v2958_v60  ;;  %2969 = vst [vmem:[#allocation2 + $0x18] sm:$0xc] %v2961_v53  ;;  %v2951_v54 = vmul.f32 %v2943_v14, %v2926_v32  ;;  %v2952_v55 = vmul.f32 %v2944_v11, %v2927_v36  ;;  %v3173_v6 = vmul.f32 %v3165_v43, %v2926_v32  ;;  %v3097_v60 = vld [vmem:[#allocation8 + $0x20] sm:$0x3] }
 0x3b3   : > { %3191 = vst [vmem:[#allocation2 + $0x30] sm:$0xc0] %v3183_v0  ;;  %3192 = vst [vmem:[#allocation2 + $0x38] sm:$0xc0] %v3184_v59  ;;  %v3174_v7 = vmul.f32 %v3166_v47, %v2927_v36  ;;  %v5731_v63 = vand.u32 4294901760, %v3231_v13 }
 0x3b4   : > { %v2959_v2 = vrot.slane %v2951_v54, 6  ;;  %v2960_v17 = vrot.slane %v2952_v55, 6  ;;  %v3181_v24 = vrot.slane %v3173_v6, 2  ;;  %v2978_v40 = vpop.permute.xlu0 %2977  ;;  %v2971_v41 = vpop.permute.xlu1 %2970  ;;  %v3100_v55 = vld [vmem:[#allocation8 + $0x38] sm:$0x3] }
 0x3b5   : > { %v3182_v26 = vrot.slane %v3174_v7, 2  ;;  %v2981_v42 = vsel %vm1575_vm4, %v2978_v40, %v2971_v41  ;;  %v2986_v46 = vsel %vm1575_vm4, %v2971_v41, %v2974_v1  ;;  %v3098_v6 = vld [vmem:[#allocation8 + $0x28] sm:$0x3]  ;;  %v3099_v7 = vld [vmem:[#allocation8 + $0x30] sm:$0x3] }
 0x3b6   : > { %2967 = vst [vmem:[#allocation2 + $0x8] sm:$0xc] %v2959_v2  ;;  %2968 = vst [vmem:[#allocation2 + $0x10] sm:$0xc] %v2960_v17  ;;  %v3003_v3 = vmul.f32 %v2995_v10, %v2986_v46  ;;  %v3006_v4 = vmul.f32 %v2998_v39, %v2981_v42  ;;  %v3211_v8 = vmul.f32 %v3203_v37, %v2981_v42  ;;  %v3049_v39 = vrot.slane %v3041_v5, 6 }
 0x3b7   : > { %3189 = vst [vmem:[#allocation2 + $0x20] sm:$0xc0] %v3181_v24  ;;  %3190 = vst [vmem:[#allocation2 + $0x28] sm:$0xc0] %v3182_v26  ;;  %v3212_v35 = vmul.f32 %v3204_v45, %v2986_v46 }
 0x3b8   : > { %v3011_v33 = vrot.slane %v3003_v3, 4  ;;  %v3014_v34 = vrot.slane %v3006_v4, 4  ;;  %3215 = vst [vmem:[#allocation2 + $0x50] sm:$0x3] %v3211_v8  ;;  %v3027_v44 = vpop.permute.xlu0 %3026  ;;  %v2976_v51 = vpop.permute.xlu1 %2975 }
 0x3b9   : > { %3216 = vst [vmem:[#allocation2 + $0x58] sm:$0x3] %v3212_v35  ;;  %v2979_v14 = vsel %vm1575_vm4, %v2974_v1, %v2976_v51  ;;  %v2980_v11 = vsel %vm1575_vm4, %v2976_v51, %v2978_v40  ;;  %v5739_v35 = vsub.f32 %v3231_v13, %v5731_v63 }
 0x3ba   : > { %3019 = vst [vmem:[#allocation2] sm:$0x30] %v3011_v33  ;;  %3022 = vst [vmem:[#allocation2 + $0x18] sm:$0x30] %v3014_v34  ;;  %v3004_v19 = vmul.f32 %v2996_v21, %v2979_v14  ;;  %v3005_v25 = vmul.f32 %v2997_v20, %v2980_v11  ;;  %v3209_v29 = vmul.f32 %v3201_v49, %v2979_v14 }
 0x3bb   : > { %v3210_v31 = vmul.f32 %v3202_v50, %v2980_v11 }
 0x3bc   : > { %v3012_v43 = vrot.slane %v3004_v19, 4  ;;  %v3013_v47 = vrot.slane %v3005_v25, 4  ;;  %3213 = vst [vmem:[#allocation2 + $0x40] sm:$0x3] %v3209_v29  ;;  %v3031_v61 = vpop.permute.xlu0 %3030  ;;  %v3024_v62 = vpop.permute.xlu1 %3023  ;;  %v5749_v25 = vand.u32 4294901760, %v5739_v35 }
 0x3bd   : > { %3214 = vst [vmem:[#allocation2 + $0x48] sm:$0x3] %v3210_v31  ;;  %v3034_v27 = vsel %vm1629_vm5, %v3031_v61, %v3024_v62  ;;  %v3039_v48 = vsel %vm1629_vm5, %v3024_v62, %v3027_v44 }
 0x3be   : > { %3020 = vst [vmem:[#allocation2 + $0x8] sm:$0x30] %v3012_v43  ;;  %3021 = vst [vmem:[#allocation2 + $0x10] sm:$0x30] %v3013_v47  ;;  %v3056_v58 = vmul.f32 %v3048_v15, %v3039_v48  ;;  %v3059_v10 = vmul.f32 %v3051_v16, %v3034_v27 }
 0x3bf   : > { %v3228_v8 = vld [vmem:[#allocation2 + $0x50] sm:$0x7] }
 0x3c0   : > { %v3064_v53 = vrot.slane %v3056_v58, 2  ;;  %v3067_v0 = vrot.slane %v3059_v10, 2  ;;  %v3083_v59 = vpop.permute.xlu0 %3082  ;;  %v3029_v1 = vpop.permute.xlu1 %3028  ;;  %v3229_v12 = vld [vmem:[#allocation2 + $0x58] sm:$0x7]  ;;  %v3240_v15 = vsel %vm1833_vm8, %v3228_v8, 0 }
 0x3c1   : > { %v3088_v28 = vsel %vm1686_vm7, %v5707_v38, %v3083_v59  ;;  %v3032_v32 = vsel %vm1629_vm5, %v3027_v44, %v3029_v1  ;;  %v3033_v36 = vsel %vm1629_vm5, %v3029_v1, %v3031_v61  ;;  %v3243_v3 = vsel %vm1833_vm8, %v3229_v12, 0 }
 0x3c2   : > { %3072 = vst [vmem:[#allocation2] sm:$0xc0] %v3064_v53  ;;  %3075 = vst [vmem:[#allocation2 + $0x18] sm:$0xc0] %v3067_v0  ;;  %v3101_v37 = vmul.f32 %v3097_v60, %v3088_v28  ;;  %v3057_v45 = vmul.f32 %v3049_v39, %v3032_v32  ;;  %v3058_v54 = vmul.f32 %v3050_v22, %v3033_v36  ;;  %v5742_v51 = vand.u32 4294901760, %v3243_v3 }
 0x3c3   : > { %v3226_v4 = vld [vmem:[#allocation2 + $0x40] sm:$0x7]  ;;  %v5755_v47 = vand.u32 4294901760, %v3240_v15  ;;  %v3319_v60 = vsub.f32 %v5739_v35, %v5749_v25 }
 0x3c4   : > { %v3109_v21 = vrot.slane %v3101_v37, 6  ;;  %v3065_v20 = vrot.slane %v3057_v45, 2  ;;  %v3066_v2 = vrot.slane %v3058_v54, 2  ;;  %v3087_v17 = vpop.permute.xlu0 %3086  ;;  %v3085_v24 = vpop.permute.xlu1 %3084  ;;  %v3227_v42 = vld [vmem:[#allocation2 + $0x48] sm:$0x7]  ;;  %v3234_v11 = vsel %vm1833_vm8, %v3226_v4, 0 }
 0x3c5   : > { %v3096_v26 = vsel %vm1686_vm7, %v3087_v17, %v5707_v38  ;;  %v3089_v40 = vsel %vm1686_vm7, %v3083_v59, %v3085_v24  ;;  %v3090_v41 = vsel %vm1686_vm7, %v3085_v24, %v3087_v17  ;;  %v3237_v33 = vsel %vm1833_vm8, %v3227_v42, 0 }
 0x3c6   : > { %3117 = vst [vmem:[#allocation2 + $0x20] sm:$0xc] %v3109_v21  ;;  %3073 = vst [vmem:[#allocation2 + $0x8] sm:$0xc0] %v3065_v20  ;;  %v3104_v46 = vmul.f32 %v3100_v55, %v3096_v26  ;;  %v3102_v49 = vmul.f32 %v3098_v6, %v3089_v40  ;;  %v3103_v50 = vmul.f32 %v3099_v7, %v3090_v41  ;;  %v5746_v19 = vand.u32 4294901760, %v3237_v33 }
 0x3c7   : > { %3074 = vst [vmem:[#allocation2 + $0x10] sm:$0xc0] %v3066_v2  ;;  %v5753_v43 = vand.u32 4294901760, %v3234_v11  ;;  %v5758_v61 = vsub.f32 %v3243_v3, %v5742_v51  ;;  %v5777_v13 = vsub.f32 %v3240_v15, %v5755_v47  ;;  %v3320_v3 = vand.u32 4294901760, %v3319_v60 }
 0x3c8   : > { %v3112_v23 = vrot.slane %v3104_v46, 6  ;;  %v3110_v38 = vrot.slane %v3102_v49, 6  ;;  %v3111_v30 = vrot.slane %v3103_v50, 6  ;;  %v5763_v58 = vsub.f32 %v3237_v33, %v5746_v19 }
 0x3c9   : > { %v3221_v34 = vld [vmem:[#allocation2 + $0x18] sm:$0xff]  ;;  %v3218_v44 = vld [vmem:[#allocation2] sm:$0xff]  ;;  %v5774_v1 = vsub.f32 %v3234_v11, %v5753_v43  ;;  %v3870_v32 = vand.u32 4294901760, %v5758_v61 }
 0x3ca   : > { %3120 = vst [vmem:[#allocation2 + $0x38] sm:$0xc] %v3112_v23  ;;  %3118 = vst [vmem:[#allocation2 + $0x28] sm:$0xc] %v3110_v38  ;;  %v3762_v14 = vand.u32 4294901760, %v3221_v34  ;;  %v3247_v16 = vand.u32 4294901760, %v3218_v44 }
 0x3cb   : > { %3119 = vst [vmem:[#allocation2 + $0x30] sm:$0xc] %v3111_v30  ;;  %v3353_v12 = vand.u32 4294901760, %v5763_v58  ;;  %v3871_v33 = vsub.f32 %v5758_v61, %v3870_v32  ;;  %v3359_v15 = vand.u32 4294901760, %v5774_v1 }
 0x3cc   : > { %v5751_v31 = vsub.f32 %v3221_v34, %v3762_v14  ;;  %v5760_v52 = vsub.f32 %v3218_v44, %v3247_v16  ;;  %v3876_v34 = vand.u32 4294901760, %v5777_v13 }
 0x3cd   : > { %v3219_v29 = vld [vmem:[#allocation2 + $0x8] sm:$0xff]  ;;  %v3222_v5 = vld [vmem:[#allocation2 + $0x20] sm:$0xff]  ;;  %v3354_v11 = vsub.f32 %v5763_v58, %v3353_v12 }
 0x3ce   : > { %v3220_v18 = vld [vmem:[#allocation2 + $0x10] sm:$0xff]  ;;  %v3245_v62 = vand.u32 4294901760, %v3219_v29  ;;  %v3251_v27 = vand.u32 4294901760, %v3222_v5  ;;  %v3846_v28 = vand.u32 4294901760, %v5751_v31  ;;  %v3335_v55 = vand.u32 4294901760, %v5760_v52 }
 0x3cf   : > { %v3764_v48 = vand.u32 4294901760, %v3220_v18 }
 0x3d0   : > { %v5765_v10 = vsub.f32 %v3219_v29, %v3245_v62  ;;  %v5767_v39 = vsub.f32 %v3222_v5, %v3251_v27  ;;  %v5794_v24 = vpack.c.bf16 %v3251_v27, %v3247_v16  ;;  %v3847_v49 = vsub.f32 %v5751_v31, %v3846_v28 }
 0x3d1   : > { %v5769_v22 = vsub.f32 %v3220_v18, %v3764_v48  ;;  %v3223_v53 = vld [vmem:[#allocation2 + $0x28] sm:$0xff]  ;;  %v3225_v0 = vld [vmem:[#allocation2 + $0x38] sm:$0xff]  ;;  %v3336_v4 = vsub.f32 %v5760_v52, %v3335_v55 }
 0x3d2   : > { %v3224_v59 = vld [vmem:[#allocation2 + $0x30] sm:$0xff]  ;;  %v3249_v36 = vand.u32 4294901760, %v3223_v53  ;;  %v3766_v37 = vand.u32 4294901760, %v3225_v0  ;;  %v3329_v54 = vand.u32 4294901760, %v5765_v10  ;;  %v3347_v6 = vand.u32 4294901760, %v5767_v39 }
 0x3d3   : > { %v3768_v45 = vand.u32 4294901760, %v3224_v59  ;;  %v3852_v7 = vand.u32 4294901760, %v5769_v22  ;;  %v3848_v5 = vand.u32 4294901760, %v3847_v49 }
 0x3d4   : > { %v5786_v21 = vpack.c.bf16 %v3249_v36, %v3245_v62  ;;  %v5788_v20 = vsub.f32 %v3223_v53, %v3249_v36  ;;  %v5790_v2 = vpack.c.bf16 %v3766_v37, %v3762_v14  ;;  %v5792_v17 = vsub.f32 %v3225_v0, %v3766_v37 }
 0x3d5   : > { %v5796_v26 = vpack.c.bf16 %v3768_v45, %v3764_v48  ;;  %v5798_v40 = vsub.f32 %v3224_v59, %v3768_v45  ;;  %v3348_v41 = vsub.f32 %v5767_v39, %v3347_v6  ;;  %v3330_v42 = vsub.f32 %v5765_v10, %v3329_v54 }
 0x3d6   : > { %4620 = vmatprep.subr.bf16.mxu0 %v5786_v21  ;;  %4644 = vmatprep.subr.bf16.mxu1 %v5790_v2  ;;  %v3341_v46 = vand.u32 4294901760, %v5788_v20  ;;  %v3858_v50 = vand.u32 4294901760, %v5792_v17  ;;  %v3853_v8 = vsub.f32 %v5769_v22, %v3852_v7  ;;  %v3337_v62 = vand.u32 4294901760, %v3336_v4 }
 0x3d7   : > { %4622 = vmatpush1.bf16.msra.mxu0 %v5794_v24  ;;  %4646 = vmatpush1.bf16.msra.mxu1 %v5796_v26  ;;  %v3864_v23 = vand.u32 4294901760, %v5798_v40  ;;  %v3349_v44 = vand.u32 4294901760, %v3348_v41  ;;  %v3331_v16 = vand.u32 4294901760, %v3330_v42  ;;  %v3877_v0 = vsub.f32 %v5777_v13, %v3876_v34 }
 0x3d8   : > { %3254 = vmatprep.subr.mxu0 %v5746_v19  ;;  %3771 = vmatprep.subr.mxu1 %v5742_v51  ;;  %v3342_v38 = vsub.f32 %v5788_v20, %v3341_v46  ;;  %v3859_v30 = vsub.f32 %v5792_v17, %v3858_v50  ;;  %v3854_v27 = vand.u32 4294901760, %v3853_v8  ;;  %v3360_v37 = vsub.f32 %v5774_v1, %v3359_v15 }
 0x3d9   : > { %v3865_v14 = vsub.f32 %v5798_v40, %v3864_v23  ;;  %v4625_v59 = vpack.c.bf16 %v3349_v44, %v3337_v62  ;;  %v3355_v45 = vand.u32 4294901760, %v3354_v11  ;;  %v3872_v41 = vand.u32 4294901760, %v3871_v33 }
 0x3da   : > { %v3343_v29 = vand.u32 4294901760, %v3342_v38  ;;  %v3860_v18 = vand.u32 4294901760, %v3859_v30  ;;  %v3361_v42 = vand.u32 4294901760, %v3360_v37  ;;  %v3878_v49 = vand.u32 4294901760, %v3877_v0 }
 0x3db   : > { %3256 = vmatpush1.msra.mxu0 %v5753_v43  ;;  %3773 = vmatpush1.msra.mxu1 %v5755_v47  ;;  %v3866_v48 = vand.u32 4294901760, %v3865_v14  ;;  %v4651_v4 = vpack.c.bf16 %v5792_v17, %v5751_v31  ;;  %v4629_v8 = vpack.c.bf16 %v5767_v39, %v5760_v52  ;;  %v4653_v38 = vpack.c.bf16 %v5798_v40, %v5769_v22 }
 0x3dc   : > { %3321 = vmatmul.mubr.f32.vlgmr.msra.gmra.mrb[4].mxu0 %v3320_v3  ;;  %3838 = vmatmul.mubr.f32.vlgmr.msra.gmra.mrb[4].mxu1 %v3320_v3  ;;  %v4623_v60 = vpack.c.bf16 %v3343_v29, %v3331_v16  ;;  %v4647_v53 = vpack.c.bf16 %v3860_v18, %v3848_v5  ;;  %v4627_v3 = vpack.c.bf16 %v5788_v20, %v5765_v10  ;;  %v4290_v31 = vstv %s4467_s12  ;;  %s4889_s12 = scalar_lea.vmem %s4888_s27, 128 }
 0x3dd   : > { %v4649_v36 = vpack.c.bf16 %v3866_v48, %v3854_v27  ;;  %3421 = vmatprep.mubr.f32.mxu0 %v4964_v9  ;;  %3938 = vmatprep.mubr.f32.mxu1 %v4964_v9  ;;  %v4635_v30 = vpack.c.bf16 %v3341_v46, %v3329_v54  ;;  %v4637_v10 = vpack.c.bf16 %v3347_v6, %v3335_v55  ;;  %v4972_v52 = vmov 1966171168   ;;  %p4891_p8 = scmp.lt.s32.totalorder %s4889_s12, %s4883_s26 }
 0x3de   : > { %4624 = vmatprep.subr.bf16.mxu0 %v4623_v60  ;;  %4648 = vmatprep.subr.bf16.mxu1 %v4647_v53  ;;  %v4661_v54 = vpack.c.bf16 %v3864_v23, %v3852_v7  ;;  %v4284_v39 = vstv %s4283_s14 }
 0x3df   : > { %4626 = vmatpush1.bf16.msra.mxu0 %v4625_v59  ;;  %4650 = vmatpush1.bf16.msra.mxu1 %v4649_v36  ;;  %p4892_p12 = por %p4891_p8, %p4890_p4 }
 0x3e0   : > { %3356 = vmatprep.subr.mxu0 %v3355_v45  ;;  %3873 = vmatprep.subr.mxu1 %v3872_v41 }
 0x3e1   : > { %p4893_p13 = pnand %p4892_p12, %p4886_p1 }
 0x3e3   : > { %3362 = vmatpush1.msra.mxu0 %v3361_v42  ;;  %3879 = vmatpush1.msra.mxu1 %v3878_v49 }
 0x3e4   : > { %3423 = vmatmul.mubr.f32.vlgmr.msra.gmra.mrb[4].mxu0 %v5731_v63  ;;  %4628 = vmatprep.subr.bf16.mxu0 %v4627_v3 }
 0x3e5   : > { %3940 = vmatmul.mubr.f32.vlgmr.msra.gmra.mrb[4].mxu1 %v5731_v63  ;;  %4652 = vmatprep.subr.bf16.mxu1 %v4651_v4 }
 0x3e6   : > { %4630 = vmatpush1.bf16.msra.mxu0 %v4629_v8  ;;  %4654 = vmatpush1.bf16.msra.mxu1 %v4653_v38 }
 0x3e7   : > { %3443 = vmatprep.subr.mxu0 %v5763_v58  ;;  %3960 = vmatprep.subr.mxu1 %v5758_v61  ;;  %v4324_v58 = vunpack.c.l.s4 %v4972_v52 }
 0x3e8   : > { %3505 = vmatprep.mubr.f32.mxu0 %v4964_v9  ;;  %4022 = vmatprep.mubr.f32.mxu1 %v4964_v9 }
 0x3e9   : > { %v4325_v7 = vunpack.c.0.s8 %v4324_v58 }
 0x3ea   : > { %3446 = vmatpush1.msra.mxu0 %v5774_v1  ;;  %3963 = vmatpush1.msra.mxu1 %v5777_v13  ;;  %v4312_v13 = vstv %s4311_s15 }
 0x3eb   : > { %4632 = vmatprep.subr.bf16.mxu0 %v5786_v21  ;;  %4656 = vmatprep.subr.bf16.mxu1 %v5790_v2 }
 0x3ec   : > { %3508 = vmatmul.mubr.f32.vlgmr.msra.gmra.mrb[4].mxu0 %v5739_v35 }
 0x3ed   : > { %4634 = vmatpush1.bf16.msra.mxu0 %v5794_v24  ;;  %4025 = vmatmul.mubr.f32.vlgmr.msra.gmra.mrb[4].mxu1 %v5739_v35  ;;  %v4659_v35 = vpack.c.bf16 %v3858_v50, %v3846_v28 }
 0x3ee   : > { %4658 = vmatpush1.bf16.msra.mxu1 %v5796_v26  ;;  %3523 = vmatprep.subr.mxu0 %v5746_v19 }
 0x3ef   : > { %4040 = vmatprep.subr.mxu1 %v5742_v51  ;;  %3584 = vmatprep.mubr.f32.mxu0 %v4964_v9 }
 0x3f0   : > { %4101 = vmatprep.mubr.f32.mxu1 %v4964_v9 }
 0x3f1   : > { %3525 = vmatpush1.msra.mxu0 %v5753_v43 }
 0x3f2   : > { %4042 = vmatpush1.msra.mxu1 %v5755_v47  ;;  %4636 = vmatprep.subr.bf16.mxu0 %v4635_v30 }
 0x3f3   : > { %4660 = vmatprep.subr.bf16.mxu1 %v4659_v35 }
 0x3f4   : > { %3588 = vmatmul.mubr.f32.vlgmr.msra.gmra.mrb[4].mxu0 %v5749_v25 }
 0x3f5   : > { %4638 = vmatpush1.bf16.msra.mxu0 %v4637_v10  ;;  %4105 = vmatmul.mubr.f32.vlgmr.msra.gmra.mrb[4].mxu1 %v5749_v25 }
 0x3f6   : > { %4662 = vmatpush1.bf16.msra.mxu1 %v4661_v54  ;;  %3613 = vmatprep.subr.mxu0 %v3353_v12 }
 0x3f7   : > { %4130 = vmatprep.subr.mxu1 %v3870_v32  ;;  %3676 = vmatprep.mubr.f32.mxu0 %v4964_v9 }
 0x3f8   : > { %4193 = vmatprep.mubr.f32.mxu1 %v4964_v9 }
 0x3f9   : > { %3617 = vmatpush1.msra.mxu0 %v3359_v15 }
 0x3fa   : > { %4134 = vmatpush1.msra.mxu1 %v3876_v34  ;;  %4640 = vmatprep.subr.bf16.mxu0 %v5786_v21 }
 0x3fb   : > { %4664 = vmatprep.subr.bf16.mxu1 %v5790_v2 }
 0x3fc   : > { %3678 = vmatmul.mubr.f32.vlgmr.msra.gmra.mrb[4].mxu0 %v5731_v63 }
 0x3fd   : > { %4642 = vmatpush1.bf16.msra.mxu0 %v5794_v24  ;;  %4195 = vmatmul.mubr.f32.vlgmr.msra.gmra.mrb[4].mxu1 %v5731_v63 }
 0x3fe   : > { %4666 = vmatpush1.bf16.msra.mxu1 %v5796_v26  ;;  %3693 = vmatprep.subr.mxu0 %v5746_v19 }
 0x3ff   : > { %4210 = vmatprep.subr.mxu1 %v5742_v51  ;;  %3754 = vmatprep.mubr.f32.mxu0 %v4964_v9 }
 0x400   : > { %4271 = vmatprep.mubr.f32.mxu1 %v4964_v9 }
 0x401   : > { %3695 = vmatpush1.msra.mxu0 %v5753_v43 }
 0x402   : > { %4212 = vmatpush1.msra.mxu1 %v5755_v47 }
 0x404   : > { %3756 = vmatmul.mubr.f32.vlgmr.msra.gmra.mrb[4].mxu0 %v5731_v63 }
 0x405   : > { %4273 = vmatmul.mubr.f32.vlgmr.msra.gmra.mrb[4].mxu1 %v5731_v63  ;;  %v4327_v63 = vshrl.u32 %v1471_v56, 7 }
 0x407   : > { %v4328_v56 = vsub.s32 %v4325_v7, %v4327_v63 }
 0x4d7   : > { %v3757_v25 = vpop.f32.mrb[4].mxu0 }
 0x4d8   : > { %v4279_v19 = vmax.f32 %v3757_v25, 0.0  ;;  %v4274_v61 = vpop.f32.mrb[4].mxu1  ;;  %v3759_v51 = vpop.f32.mrb[5].mxu0 }
 0x4d9   : > { %v4281_v9 = vmax.f32 %v4274_v61, 0.0  ;;  %v4280_v22 = vmax.f32 %v3759_v51, 0.0  ;;  %v4276_v43 = vpop.f32.mrb[5].mxu1 }
 0x4da   : > { %v4291_v1 = vmul.f32 %v4290_v31, %v4279_v19  ;;  %v4282_v47 = vmax.f32 %v4276_v43, 0.0  ;;  %v4285_v55 = vmul.f32 %v4284_v39, %v4279_v19 }
 0x4db   : > { %v4293_v28 = vmul.f32 %v4290_v31, %v4281_v9  ;;  %v4292_v32 = vmul.f32 %v4290_v31, %v4280_v22  ;;  %v4287_v21 = vmul.f32 %v4284_v39, %v4281_v9  ;;  %v4286_v2 = vmul.f32 %v4284_v39, %v4280_v22 }
 0x4dc   : > { %v4299_v6 = vrot.slane %v4291_v1, 1  ;;  %v4294_v12 = vmul.f32 %v4290_v31, %v4282_v47  ;;  %v4288_v26 = vmul.f32 %v4284_v39, %v4282_v47 }
 0x4dd   : > { %v4301_v20 = vrot.slane %v4293_v28, 1  ;;  %v4300_v17 = vrot.slane %v4292_v32, 1 }
 0x4de   : > { %v4307_v24 = vadd.f32 %v4299_v6, %v4285_v55  ;;  %v4302_v40 = vrot.slane %v4294_v12, 1 }
 0x4df   : > { %v4309_v46 = vadd.f32 %v4301_v20, %v4287_v21  ;;  %v4308_v50 = vadd.f32 %v4300_v17, %v4286_v2 }
 0x4e0   : > { %v4313_v23 = vadd.f32 %v4312_v13, %v4307_v24  ;;  %v4310_v33 = vadd.f32 %v4302_v40, %v4288_v26 }
 0x4e1   : > { %v4315_v34 = vadd.f32 %v4312_v13, %v4309_v46  ;;  %v4314_v44 = vadd.f32 %v4312_v13, %v4308_v50 }
 0x4e2   : > { %v4316_v14 = vadd.f32 %v4312_v13, %v4310_v33 }
 0x4e3   : > { %v4321_v11 = vcombine.low %v4313_v23, %v4314_v44 }
 0x4e4   : > { %v4322_v15 = vcombine.low %v4315_v34, %v4316_v14 }
 0x4e5   : > { %v4329_v16 = vrot.slane %v4321_v11, %v4328_v56 }
 0x4e6   : > { %v4336_v29 = vrot.slane %v4322_v15, %v4328_v56 }
 0x4e8   : > { %v4337_v5 = vcombine.low %v4329_v16, %v4336_v29 }
 0x4ea   : > { %v4344_v18 = vrot.slane %v4337_v5, %v4328_v56 }
 0x4ec   : > { %4346 = vst.msk [vmem:[%s353_s23] sm:$0xf] %vm5444_vm1, %v4344_v18 }
 0x4ed   : > { %4896 = shalt.err (!%p4893_p13)
}
 0x4ee   : > { %s4897_s28 = scalar_lea.hbm %s5927_s11, 64  ;;  %s4901_s18 = scalar_lea.hbm %s5981_s8, 128 }
 0x4ef   : > { %p4898_p2 = scmp.ne.s32.totalorder %s5927_s11, %s4897_s28  ;;  %p4902_p0 = scmp.lt.u32.totalorder %s5927_s11, %s5981_s8 }
 0x4f0   : > { %p4903_p3 = scmp.lt.u32.totalorder %s4901_s18, %s4897_s28  ;;  %p4905_p9 = scmp.lt.u32.totalorder %s4897_s28, %s5927_s11 }
 0x4f1   : > { %p4899_p6 = pnand %p4898_p2, %p5126_p7 }
 0x4f2   : > { %p4904_p5 = por %p4903_p3, %p4902_p0 }
 0x4f3   : > { %p4900_p11 = pneg %p4899_p6 }
 0x4f4   : > { %p4906_p10 = por %p4905_p9, %p4904_p5 }
 0x4f6   : > { %p4907_p1 = pnand %p4906_p10, %p4900_p11 }
 0x4f8   : > { %4910 = shalt.err (!%p4907_p1)
}
 0x4f9   : > { %4741 = dma.vmem_to_hbm [thread:$0]  (%p5126_p7), %s5929_s24, 64, %s5927_s11, %s4348_s21  }
 0x4fa PF: > { %s4374_s19 = sand.u32 1, %s4945_s29   ;;  %p6002_p4 = scmp.ne.s32.totalorder %s5987_s13, 0 }
 0x4fb   : > { %p6003_p8 = scmp.ge.s32.totalorder %s4957_s10, 2  ;;  %s4375_s17 = scalar_lea.sflag [#allocation6], %s4374_s19 }
 0x4fd   : > { %p4755_p12 = pnand %p6003_p8, %p6002_p4 }
 0x4ff   : > { %4940 = dma.done.wait (!%p4755_p12), %s4375_s17, 64  }
 0x500   : > { %4942 = vsyncadd (!%p4755_p12), %s4375_s17, 4294967232  ;;  %p24_p13 = scmp.ge.s32.totalorder %s5116_s16, 4   ;;  %s6004_s29 = smov %s4949_s30 }
 0x501   : > { %s6005_s30 = smov %s4953_s9  ;;  %s6006_s9 = smov %s5132_s25 }
 0x502   : > { %s6007_s10 = smov %s5116_s16  ;;  %26 = sbr.rel (!%p24_p13) target bundleno = 9 (0x9), region = 107 }
 0x509   :  { %4380 = vsyncpa [#allocation5], 1 }
 0x50a   :  { %4382 = vsyncpa [#allocation5 + $0x1], 1 }
 0x50b   :  { %4383 = vsyncpa [#allocation9], 1 }
 0x50c   :  { %4384 = vsyncpa [#allocation6], 1 }
 0x50d   :  { %4386 = vsyncpa [#allocation6 + $0x1], 1 }
 0x50e   :  { %4387 = vsyncpa [#allocation7], 1 }
 0x50f   :  { %4389 = vsyncpa [#allocation7 + $0x1], 1 }

</bundles_post_ra>
